<compile_context>
chip_gen: v7x
topology: tpu7x:2x2x1
jax: 0.10.0
libtpu: 0.0.40
codegen_flags: <defaults>
</compile_context>

<pallas_src>
import jax
import jax.numpy as jnp
from jax.experimental import pallas as pl
from jax.experimental.pallas import tpu as pltpu

# ---- model dims (from GNN.__init__) ----
NUM_FEATURES = 60       # self.num_features
N_CODES = 5             # self.n_diagnosis_codes
EMB_SIZE = 5            # self.emb_size
HIDDEN_SIZE = 10        # self.hidden_size
HIDDEN_CHANNELS = 15    # self.hidden_channels
NUM_CLASSES = 3         # self.num_classes
NUM_NEW_FEATURES = 20   # self.num_new_features

# small synthetic graph (stands in for the pickled Splice graph; 3190 nodes
# in the original -> padded to 3200 at production scale)
N0 = 16                 # number of stored nodes in x_0
BATCH = 8               # number of new (test) samples (keep a multiple of 8)

VMEM = pl.BlockSpec(memory_space=pltpu.MemorySpace.VMEM)
SMEM = pl.BlockSpec(memory_space=pltpu.MemorySpace.SMEM)


# ------------------------------------------------------------------ kernels
def _feature_kernel(x_ref, emb_ref, fcw_ref, w2_ref, fcb_ref,
                    x0t_ref, invn0_ref, colmask_ref, a_ref, xnew_ref):
    """Fused: emb-weighted sum -> relu -> fc -> relu -> fc2 -> relu -> cosine.

    x_ref      : (N_CODES, B, NUM_FEATURES)  code axis leading, so every slice
                                             is a plain 2-D (B, 60) tile
    emb_ref    : (N_CODES, EMB_SIZE) in SMEM (25 scalars)
    fcw_ref    : (NUM_FEATURES, NUM_NEW_FEATURES)          fc weight, (in, out)
    w2_ref     : (EMB_SIZE, NUM_NEW_FEATURES, HIDDEN_SIZE) fc2 weight regrouped
                 per emb slot so that x_new = relu(sum_e g_e @ w2[e] + fc2_b)
                 reproduces torch's transpose(1,2) -> reshape(B,-1) -> fc2
    fcb_ref    : (2, NUM_NEW_FEATURES) row 0 = fc bias, row 1[:10] = fc2 bias
    x0t_ref    : (HIDDEN_SIZE, N0_pad)  stored node features, pre-transposed,
                 zero-padded columns beyond the real N0
    invn0_ref  : (1, N0_pad)  precomputed 1 / ||x_0||_row (0 for padded cols)
    colmask_ref: (1, N0_pad)  0 for real columns, -1e9 for padded columns
    a_ref      : (B, N0_pad)  cosine similarities (lane-dense main output)
    xnew_ref   : (B, HIDDEN_SIZE)
    """
    f32 = jnp.float32
    b = x_ref.shape[1]

    fcb = fcb_ref[...]
    fc_b = fcb[0:1, :]                               # (1, 20)
    fc2_b = fcb[1:2, :HIDDEN_SIZE]                   # (1, 10)
    fcw = fcw_ref[...]                               # (60, 20)

    # hoist the five (B, 60) code slices and all 25 SMEM embedding scalars
    # out of the unrolled loops (each is reused for every emb slot)
    x_c = [x_ref[c] for c in range(N_CODES)]
    emb = [[emb_ref[c, e] for e in range(EMB_SIZE)] for c in range(N_CODES)]

    acc = jnp.zeros((b, HIDDEN_SIZE), f32)
    for e in range(EMB_SIZE):
        # (x.unsqueeze(3) * emb_weight).sum(dim=2) restricted to emb slot e
        h_e = x_c[0] * emb[0][e]
        for c in range(1, N_CODES):
            h_e = h_e + x_c[c] * emb[c][e]
        h_e = jnp.maximum(h_e, 0.0)                                      # (B, 60)
        # transpose(1,2) -> fc -> relu (fc contracts over the feature axis)
        g_e = jnp.maximum(
            jnp.dot(h_e, fcw, preferred_element_type=f32) + fc_b, 0.0)   # (B, 20)
        # transpose(1,2) -> reshape(B,-1) -> fc2, accumulated over emb slots
        acc = acc + jnp.dot(g_e, w2_ref[e], preferred_element_type=f32)  # (B, 10)
    x_new = jnp.maximum(acc + fc2_b, 0.0)
    xnew_ref[...] = x_new

    # cosine similarity against the stored training nodes
    a = jnp.dot(x_new, x0t_ref[...], preferred_element_type=f32)         # (B, N0_pad)
    nx2 = jnp.sum(x_new * x_new, axis=1, keepdims=True)                  # (B, 1)
    # zero-guard: an all-zero row after the fc2 relu must not produce NaN
    inv_nx = jnp.where(nx2 > 0.0, jax.lax.rsqrt(nx2), 0.0)
    # padded columns pushed to -1e9 so they can never enter the top-6
    a_ref[...] = a * inv_nx * invn0_ref[...] + colmask_ref[...]


def _gnn_kernel(top5_ref, h1s_ref, xnew_ref,
                wr1_ref, wl2_ref, wr2_ref, wlin_ref, bias_ref, out_ref):
    """conv1(new rows) -> SAGEConv2 -> linear -> softmax, for the B new rows only.

    top5_ref : (B, 5) int32   top-5 stored-node neighbours of each new node
    h1s_ref  : (N0_pad, HIDDEN_CHANNELS) precomputed relu'd conv1 activations of
               the stored nodes (batch-invariant; hoisted to prepare_params)
    xnew_ref : (B, HIDDEN_SIZE)
    wr1_ref  : (10, 15) conv1.lin_r^T        wl2_ref : (15, 10) conv2.lin_l^T
    wr2_ref  : (15, 10) conv2.lin_r^T        wlin_ref: (10, 3)  linear^T
    bias_ref : (3, 15) row0 = conv1.lin_l bias, row1[:10] = conv2.lin_l bias,
               row2[:3] = linear bias
    out_ref  : (B, NUM_CLASSES) softmax probabilities
    """
    f32 = jnp.float32
    b = xnew_ref.shape[0]
    n0p = h1s_ref.shape[0]

    bias = bias_ref[...]
    b1 = bias[0:1, :]                                 # (1, 15) conv1.lin_l bias
    b2 = bias[1:2, :HIDDEN_SIZE]                      # (1, 10) conv2.lin_l bias
    blin = bias[2:3, :NUM_CLASSES]                    # (1, 3)  linear bias

    # Build the conv2 mean-aggregation rows of the B new nodes in-kernel from
    # the top-5 indices (old src -> new dst edges; edge_0 has no edges into the
    # new nodes, so these are their only incoming edges in the combined graph).
    top5 = top5_ref[...]                                              # (B, 5) i32
    col = jax.lax.broadcasted_iota(jnp.int32, (b, n0p), 1)            # (B, N0_pad)
    m2 = jnp.zeros((b, n0p), f32)
    for k in range(5):
        m2 = m2 + jnp.where(col == top5[:, k:k + 1], 1.0, 0.0)
    deg = jnp.sum(m2, axis=1, keepdims=True)          # == 5 (top_k idx distinct)
    m2 = m2 / jnp.where(deg > 0.0, deg, 1.0)

    # conv2 mean aggregation over the precomputed stored-node activations
    agg2 = jnp.dot(m2, h1s_ref[...], preferred_element_type=f32)      # (B, 15)

    # conv1 on the new rows: conv1 uses edge_0 only, which has no edges into
    # the new nodes, so the mean aggregation is zero -> lin_l bias + lin_r(x).
    x_new = xnew_ref[...]                                             # (B, 10)
    h1_new = jnp.maximum(
        jnp.dot(x_new, wr1_ref[...], preferred_element_type=f32) + b1, 0.0)
    # F.dropout(p=0.5) is the identity in eval mode.

    # conv2: lin_l(mean aggregation) + lin_r(self)
    h2 = (jnp.dot(agg2, wl2_ref[...], preferred_element_type=f32) + b2
          + jnp.dot(h1_new, wr2_ref[...], preferred_element_type=f32))  # (B, 10)

    logits = jnp.dot(h2, wlin_ref[...], preferred_element_type=f32) + blin
    m = jnp.max(logits, axis=1, keepdims=True)
    e = jnp.exp(logits - m)
    out_ref[...] = e / jnp.sum(e, axis=1, keepdims=True)              # exact softmax


# ------------------------------------------------------- kernel call wrappers
def feature_forward(prep, x_codes):
    b = x_codes.shape[1]
    n0p = prep['x0_t'].shape[1]
    return pl.pallas_call(
        _feature_kernel,
        out_shape=(jax.ShapeDtypeStruct((b, n0p), jnp.float32),
                   jax.ShapeDtypeStruct((b, HIDDEN_SIZE), jnp.float32)),
        in_specs=[VMEM, SMEM, VMEM, VMEM, VMEM, VMEM, VMEM, VMEM],
        out_specs=(VMEM, VMEM),
    )(x_codes, prep['emb'], prep['fc_w_t'], prep['fc2_w_grouped'],
      prep['fc_bias'], prep['x0_t'], prep['inv_norm0'], prep['colmask'])


def gnn_head(prep, x_new, top5):
    b = x_new.shape[0]
    # Everything is VMEM-resident (h1_stored is ~188 KiB even at production
    # N0_pad=3200); no grid, no scratch, no vmem_limit tuning needed.
    return pl.pallas_call(
        _gnn_kernel,
        out_shape=jax.ShapeDtypeStruct((b, NUM_CLASSES), jnp.float32),
        in_specs=[VMEM] * 8,
        out_specs=VMEM,
    )(top5, prep['h1_stored'], x_new,
      prep['wr1_t'], prep['wl2_t'], prep['wr2_t'], prep['wlin_t'],
      prep['gnn_bias'])


# --------------------------------------------------------------- full forward
def gnntest_forward(prep, x_in):
    """x_in: (NUM_FEATURES, B, N_CODES) float32 (one-hot-ish diagnosis codes)."""
    # permute(1,0,2) of the torch module; additionally move the code axis to
    # the front so every Pallas slice is a plain 2-D (B, 60) tile.
    x_codes = jnp.transpose(x_in, (2, 1, 0)).astype(jnp.float32)       # (5, B, 60)

    a, x_new = feature_forward(prep, x_codes)                          # (B,N0p),(B,10)

    # TODO(synk): top-6 neighbour selection is a sort; no clean Pallas
    # primitive, so it stays in jax.lax.top_k between the two kernels.
    top_vals, top_idx = jax.lax.top_k(a, 6)
    # tolerance instead of the reference's exact == 1.0: after f32 matmul /
    # rsqrt a true self-match can land at 0.9999999.
    self_match = top_vals[:, 0] >= 1.0 - 1e-6
    top5 = jnp.where(self_match[:, None],
                     top_idx[:, 1:], top_idx[:, :5]).astype(jnp.int32)  # (B, 5)

    return gnn_head(prep, x_new, top5)                                 # (B, 3)


# ------------------------------------------------------------- parameter init
def init_params(key):
    ks = jax.random.split(key, 16)

    def w(k, shape, scale=0.1):
        return (scale * jax.random.normal(k, shape)).astype(jnp.float32)

    # synthetic stand-in for the pickled node features (fc2 output is relu'd,
    # so keep x_0 strictly positive -> non-zero row norms)
    x_0 = jnp.abs(w(ks[13], (N0, HIDDEN_SIZE), 1.0)) + 0.1

    # synthetic stand-in for the pickled training-graph edges: node i receives
    # edges from (i+1), (i+2), (i+5) mod N0.  row0 = src, row1 = dst.
    dst = jnp.concatenate([jnp.arange(N0)] * 3)
    src = jnp.concatenate([(jnp.arange(N0) + k) % N0 for k in (1, 2, 5)])
    edge_0 = jnp.stack([src, dst]).astype(jnp.int32)                   # (2, 48)

    return {
        'emb': w(ks[0], (N_CODES, EMB_SIZE)),
        'fc_w': w(ks[1], (NUM_NEW_FEATURES, NUM_FEATURES)),
        'fc_b': w(ks[2], (NUM_NEW_FEATURES,)),
        'fc2_w': w(ks[3], (HIDDEN_SIZE, NUM_NEW_FEATURES * EMB_SIZE)),
        'fc2_b': w(ks[4], (HIDDEN_SIZE,)),
        # SAGEConv: lin_l (bias), lin_r (no bias)
        'conv1_lin_l_w': w(ks[5], (HIDDEN_CHANNELS, HIDDEN_SIZE)),
        'conv1_lin_l_b': w(ks[6], (HIDDEN_CHANNELS,)),
        'conv1_lin_r_w': w(ks[7], (HIDDEN_CHANNELS, HIDDEN_SIZE)),
        'conv2_lin_l_w': w(ks[8], (HIDDEN_SIZE, HIDDEN_CHANNELS)),
        'conv2_lin_l_b': w(ks[9], (HIDDEN_SIZE,)),
        'conv2_lin_r_w': w(ks[10], (HIDDEN_SIZE, HIDDEN_CHANNELS)),
        'lin_w': w(ks[11], (NUM_CLASSES, HIDDEN_SIZE)),
        'lin_b': w(ks[12], (NUM_CLASSES,)),
        'x_0': x_0,
        'edge_0': edge_0,
    }


def prepare_params(p):
    """One-time prep outside the jitted forward: weight transposes, packed
    biases, N0 padding to a 128 multiple, stored-node norms, and (new) the
    batch-invariant conv1 activations of the stored graph (h1_stored)."""
    x0 = p['x_0'].astype(jnp.float32)
    n0 = x0.shape[0]
    n0_pad = ((n0 + 127) // 128) * 128               # lane-dense cosine output
    edge0 = p['edge_0']

    # dense mean-aggregation matrix of the stored training graph (prep-time
    # only; never streamed by the per-call kernels anymore):
    # M[i, j] = multiplicity of edge j -> i, rows normalised by in-degree.
    m0 = jnp.zeros((n0, n0), jnp.float32).at[edge0[1], edge0[0]].add(1.0)
    deg = m0.sum(axis=1, keepdims=True)
    m1n = m0 / jnp.where(deg > 0, deg, 1.0)

    # conv1 over the stored graph is batch-invariant -> precompute + relu.
    # conv1(x, edge_0) on stored rows: lin_l(mean agg) + bias + lin_r(x_0)
    agg1 = m1n @ x0                                                    # (N0, 10)
    h1 = jnp.maximum(agg1 @ p['conv1_lin_l_w'].T + p['conv1_lin_l_b'][None, :]
                     + x0 @ p['conv1_lin_r_w'].T, 0.0)                 # (N0, 15)
    h1_stored = jnp.zeros((n0_pad, HIDDEN_CHANNELS), jnp.float32).at[:n0].set(h1)

    # padded stored-node features / norms / column mask for the cosine kernel
    x0_pad = jnp.zeros((n0_pad, HIDDEN_SIZE), jnp.float32).at[:n0].set(x0)
    norm0 = jnp.sqrt(jnp.sum(x0 * x0, axis=1))
    inv_norm0 = jnp.zeros((1, n0_pad), jnp.float32).at[0, :n0].set(
        1.0 / jnp.where(norm0 > 0, norm0, 1.0))
    colmask = jnp.full((1, n0_pad), -1e9, jnp.float32).at[0, :n0].set(0.0)

    # fc2 weight regrouped per embedding slot so the fused feature kernel
    # realises transpose(1,2) -> reshape(B,-1) -> fc2 as  sum_e g_e @ w2[e].
    fc2_w = p['fc2_w']
    w2 = jnp.stack([fc2_w[:, e::EMB_SIZE].T for e in range(EMB_SIZE)])  # (5, 20, 10)

    fc_bias = jnp.zeros((2, NUM_NEW_FEATURES), jnp.float32)
    fc_bias = fc_bias.at[0, :].set(p['fc_b'])
    fc_bias = fc_bias.at[1, :HIDDEN_SIZE].set(p['fc2_b'])

    gnn_bias = jnp.zeros((3, HIDDEN_CHANNELS), jnp.float32)
    gnn_bias = gnn_bias.at[0, :].set(p['conv1_lin_l_b'])
    gnn_bias = gnn_bias.at[1, :HIDDEN_SIZE].set(p['conv2_lin_l_b'])
    gnn_bias = gnn_bias.at[2, :NUM_CLASSES].set(p['lin_b'])

    return {
        'emb': p['emb'],                        # (5, 5), read as SMEM scalars
        'fc_w_t': p['fc_w'].T,                  # (60, 20)
        'fc2_w_grouped': w2,                    # (5, 20, 10)
        'fc_bias': fc_bias,                     # (2, 20)
        'x0_t': x0_pad.T,                       # (10, N0_pad)
        'inv_norm0': inv_norm0,                 # (1, N0_pad)
        'colmask': colmask,                     # (1, N0_pad)
        'h1_stored': h1_stored,                 # (N0_pad, 15) precomputed conv1
        'wr1_t': p['conv1_lin_r_w'].T,          # (10, 15)
        'wl2_t': p['conv2_lin_l_w'].T,          # (15, 10)
        'wr2_t': p['conv2_lin_r_w'].T,          # (15, 10)
        'wlin_t': p['lin_w'].T,                 # (10, 3)
        'gnn_bias': gnn_bias,                   # (3, 15)
    }


if __name__ == "__main__":
    key = jax.random.PRNGKey(0)
    k_params, k_codes = jax.random.split(key)

    prep = prepare_params(init_params(k_params))

    # input: one-hot diagnosis codes, shape (num_features, batch, n_codes)
    codes = jax.random.randint(k_codes, (NUM_FEATURES, BATCH), 0, N_CODES)
    x_in = jax.nn.one_hot(codes, N_CODES, dtype=jnp.float32)           # (60, 8, 5)

    fwd = jax.jit(gnntest_forward)
    out = jax.block_until_ready(fwd(prep, x_in))

    assert out.shape == (BATCH, NUM_CLASSES), out.shape
    assert bool(jnp.all(jnp.isfinite(out)))
    # rows of softmax output sum to ~1 (exact-divide softmax)
    assert bool(jnp.allclose(out.sum(axis=1), 1.0, atol=1e-5))
    print("KERNEL_OK")
</pallas_src>

<mosaic_0001>
module attributes {stable_mosaic.version = 11 : i64} {
  func.func @_feature_kernel(%arg0: memref<5x8x60xf32, #tpu.memory_space<vmem>>, %arg1: memref<5x5xf32, #tpu.memory_space<smem>>, %arg2: memref<60x20xf32, #tpu.memory_space<vmem>>, %arg3: memref<5x20x10xf32, #tpu.memory_space<vmem>>, %arg4: memref<2x20xf32, #tpu.memory_space<vmem>>, %arg5: memref<10x128xf32, #tpu.memory_space<vmem>>, %arg6: memref<1x128xf32, #tpu.memory_space<vmem>>, %arg7: memref<1x128xf32, #tpu.memory_space<vmem>>, %arg8: memref<8x128xf32, #tpu.memory_space<vmem>>, %arg9: memref<8x10xf32, #tpu.memory_space<vmem>>) attributes {dimension_semantics = [], scalar_prefetch = 0 : i64, scratch_operands = 0 : i64, tpu.core_type = #tpu.core_type<tc>} {
    %c0 = arith.constant 0 : index
    %c0_0 = arith.constant 0 : index
    %0 = vector.load %arg4[%c0, %c0_0] : memref<2x20xf32, #tpu.memory_space<vmem>>, vector<2x20xf32>
    %1 = vector.extract_strided_slice %0 {offsets = [0, 0], sizes = [1, 20], strides = [1, 1]} : vector<2x20xf32> to vector<1x20xf32>
    %2 = vector.extract_strided_slice %0 {offsets = [1, 0], sizes = [1, 10], strides = [1, 1]} : vector<2x20xf32> to vector<1x10xf32>
    %c0_1 = arith.constant 0 : index
    %c0_2 = arith.constant 0 : index
    %3 = vector.load %arg2[%c0_1, %c0_2] : memref<60x20xf32, #tpu.memory_space<vmem>>, vector<60x20xf32>
    %c0_3 = arith.constant 0 : index
    %c0_4 = arith.constant 0 : index
    %c0_5 = arith.constant 0 : index
    %4 = vector.load %arg0[%c0_3, %c0_4, %c0_5] : memref<5x8x60xf32, #tpu.memory_space<vmem>>, vector<1x8x60xf32>
    %5 = vector.shape_cast %4 : vector<1x8x60xf32> to vector<8x60xf32>
    %c1 = arith.constant 1 : index
    %c0_6 = arith.constant 0 : index
    %c0_7 = arith.constant 0 : index
    %6 = vector.load %arg0[%c1, %c0_6, %c0_7] : memref<5x8x60xf32, #tpu.memory_space<vmem>>, vector<1x8x60xf32>
    %7 = vector.shape_cast %6 : vector<1x8x60xf32> to vector<8x60xf32>
    %c2 = arith.constant 2 : index
    %c0_8 = arith.constant 0 : index
    %c0_9 = arith.constant 0 : index
    %8 = vector.load %arg0[%c2, %c0_8, %c0_9] : memref<5x8x60xf32, #tpu.memory_space<vmem>>, vector<1x8x60xf32>
    %9 = vector.shape_cast %8 : vector<1x8x60xf32> to vector<8x60xf32>
    %c3 = arith.constant 3 : index
    %c0_10 = arith.constant 0 : index
    %c0_11 = arith.constant 0 : index
    %10 = vector.load %arg0[%c3, %c0_10, %c0_11] : memref<5x8x60xf32, #tpu.memory_space<vmem>>, vector<1x8x60xf32>
    %11 = vector.shape_cast %10 : vector<1x8x60xf32> to vector<8x60xf32>
    %c4 = arith.constant 4 : index
    %c0_12 = arith.constant 0 : index
    %c0_13 = arith.constant 0 : index
    %12 = vector.load %arg0[%c4, %c0_12, %c0_13] : memref<5x8x60xf32, #tpu.memory_space<vmem>>, vector<1x8x60xf32>
    %13 = vector.shape_cast %12 : vector<1x8x60xf32> to vector<8x60xf32>
    %c0_14 = arith.constant 0 : index
    %c0_15 = arith.constant 0 : index
    %14 = memref.load %arg1[%c0_14, %c0_15] : memref<5x5xf32, #tpu.memory_space<smem>>
    %c0_16 = arith.constant 0 : index
    %c1_17 = arith.constant 1 : index
    %15 = memref.load %arg1[%c0_16, %c1_17] : memref<5x5xf32, #tpu.memory_space<smem>>
    %c0_18 = arith.constant 0 : index
    %c2_19 = arith.constant 2 : index
    %16 = memref.load %arg1[%c0_18, %c2_19] : memref<5x5xf32, #tpu.memory_space<smem>>
    %c0_20 = arith.constant 0 : index
    %c3_21 = arith.constant 3 : index
    %17 = memref.load %arg1[%c0_20, %c3_21] : memref<5x5xf32, #tpu.memory_space<smem>>
    %c0_22 = arith.constant 0 : index
    %c4_23 = arith.constant 4 : index
    %18 = memref.load %arg1[%c0_22, %c4_23] : memref<5x5xf32, #tpu.memory_space<smem>>
    %c1_24 = arith.constant 1 : index
    %c0_25 = arith.constant 0 : index
    %19 = memref.load %arg1[%c1_24, %c0_25] : memref<5x5xf32, #tpu.memory_space<smem>>
    %c1_26 = arith.constant 1 : index
    %c1_27 = arith.constant 1 : index
    %20 = memref.load %arg1[%c1_26, %c1_27] : memref<5x5xf32, #tpu.memory_space<smem>>
    %c1_28 = arith.constant 1 : index
    %c2_29 = arith.constant 2 : index
    %21 = memref.load %arg1[%c1_28, %c2_29] : memref<5x5xf32, #tpu.memory_space<smem>>
    %c1_30 = arith.constant 1 : index
    %c3_31 = arith.constant 3 : index
    %22 = memref.load %arg1[%c1_30, %c3_31] : memref<5x5xf32, #tpu.memory_space<smem>>
    %c1_32 = arith.constant 1 : index
    %c4_33 = arith.constant 4 : index
    %23 = memref.load %arg1[%c1_32, %c4_33] : memref<5x5xf32, #tpu.memory_space<smem>>
    %c2_34 = arith.constant 2 : index
    %c0_35 = arith.constant 0 : index
    %24 = memref.load %arg1[%c2_34, %c0_35] : memref<5x5xf32, #tpu.memory_space<smem>>
    %c2_36 = arith.constant 2 : index
    %c1_37 = arith.constant 1 : index
    %25 = memref.load %arg1[%c2_36, %c1_37] : memref<5x5xf32, #tpu.memory_space<smem>>
    %c2_38 = arith.constant 2 : index
    %c2_39 = arith.constant 2 : index
    %26 = memref.load %arg1[%c2_38, %c2_39] : memref<5x5xf32, #tpu.memory_space<smem>>
    %c2_40 = arith.constant 2 : index
    %c3_41 = arith.constant 3 : index
    %27 = memref.load %arg1[%c2_40, %c3_41] : memref<5x5xf32, #tpu.memory_space<smem>>
    %c2_42 = arith.constant 2 : index
    %c4_43 = arith.constant 4 : index
    %28 = memref.load %arg1[%c2_42, %c4_43] : memref<5x5xf32, #tpu.memory_space<smem>>
    %c3_44 = arith.constant 3 : index
    %c0_45 = arith.constant 0 : index
    %29 = memref.load %arg1[%c3_44, %c0_45] : memref<5x5xf32, #tpu.memory_space<smem>>
    %c3_46 = arith.constant 3 : index
    %c1_47 = arith.constant 1 : index
    %30 = memref.load %arg1[%c3_46, %c1_47] : memref<5x5xf32, #tpu.memory_space<smem>>
    %c3_48 = arith.constant 3 : index
    %c2_49 = arith.constant 2 : index
    %31 = memref.load %arg1[%c3_48, %c2_49] : memref<5x5xf32, #tpu.memory_space<smem>>
    %c3_50 = arith.constant 3 : index
    %c3_51 = arith.constant 3 : index
    %32 = memref.load %arg1[%c3_50, %c3_51] : memref<5x5xf32, #tpu.memory_space<smem>>
    %c3_52 = arith.constant 3 : index
    %c4_53 = arith.constant 4 : index
    %33 = memref.load %arg1[%c3_52, %c4_53] : memref<5x5xf32, #tpu.memory_space<smem>>
    %c4_54 = arith.constant 4 : index
    %c0_55 = arith.constant 0 : index
    %34 = memref.load %arg1[%c4_54, %c0_55] : memref<5x5xf32, #tpu.memory_space<smem>>
    %c4_56 = arith.constant 4 : index
    %c1_57 = arith.constant 1 : index
    %35 = memref.load %arg1[%c4_56, %c1_57] : memref<5x5xf32, #tpu.memory_space<smem>>
    %c4_58 = arith.constant 4 : index
    %c2_59 = arith.constant 2 : index
    %36 = memref.load %arg1[%c4_58, %c2_59] : memref<5x5xf32, #tpu.memory_space<smem>>
    %c4_60 = arith.constant 4 : index
    %c3_61 = arith.constant 3 : index
    %37 = memref.load %arg1[%c4_60, %c3_61] : memref<5x5xf32, #tpu.memory_space<smem>>
    %c4_62 = arith.constant 4 : index
    %c4_63 = arith.constant 4 : index
    %38 = memref.load %arg1[%c4_62, %c4_63] : memref<5x5xf32, #tpu.memory_space<smem>>
    %cst = arith.constant 0.000000e+00 : f32
    %39 = vector.broadcast %cst : f32 to vector<8x10xf32>
    %40 = vector.broadcast %14 : f32 to vector<8x60xf32>
    %41 = arith.mulf %5, %40 : vector<8x60xf32>
    %42 = vector.broadcast %19 : f32 to vector<8x60xf32>
    %43 = arith.mulf %7, %42 : vector<8x60xf32>
    %44 = arith.addf %41, %43 : vector<8x60xf32>
    %45 = vector.broadcast %24 : f32 to vector<8x60xf32>
    %46 = arith.mulf %9, %45 : vector<8x60xf32>
    %47 = arith.addf %44, %46 : vector<8x60xf32>
    %48 = vector.broadcast %29 : f32 to vector<8x60xf32>
    %49 = arith.mulf %11, %48 : vector<8x60xf32>
    %50 = arith.addf %47, %49 : vector<8x60xf32>
    %51 = vector.broadcast %34 : f32 to vector<8x60xf32>
    %52 = arith.mulf %13, %51 : vector<8x60xf32>
    %53 = arith.addf %50, %52 : vector<8x60xf32>
    %cst_64 = arith.constant 0.000000e+00 : f32
    %54 = vector.broadcast %cst_64 : f32 to vector<8x60xf32>
    %55 = arith.maximumf %53, %54 : vector<8x60xf32>
    %cst_65 = arith.constant dense<0.000000e+00> : vector<8x20xf32>
    %56 = tpu.matmul %55, %3, %cst_65 {dimension_numbers = #tpu.dot_dimension_numbers<[1], [0], [0], [1], [0, 0, 1, 1], [], []>} : vector<8x60xf32>, vector<60x20xf32>, vector<8x20xf32> -> vector<8x20xf32>
    %57 = vector.broadcast %1 : vector<1x20xf32> to vector<8x20xf32>
    %58 = arith.addf %56, %57 : vector<8x20xf32>
    %cst_66 = arith.constant 0.000000e+00 : f32
    %59 = vector.broadcast %cst_66 : f32 to vector<8x20xf32>
    %60 = arith.maximumf %58, %59 : vector<8x20xf32>
    %c0_67 = arith.constant 0 : index
    %c0_68 = arith.constant 0 : index
    %c0_69 = arith.constant 0 : index
    %61 = vector.load %arg3[%c0_67, %c0_68, %c0_69] : memref<5x20x10xf32, #tpu.memory_space<vmem>>, vector<1x20x10xf32>
    %62 = vector.shape_cast %61 : vector<1x20x10xf32> to vector<20x10xf32>
    %cst_70 = arith.constant dense<0.000000e+00> : vector<8x10xf32>
    %63 = tpu.matmul %60, %62, %cst_70 {dimension_numbers = #tpu.dot_dimension_numbers<[1], [0], [0], [1], [0, 0, 1, 1], [], []>} : vector<8x20xf32>, vector<20x10xf32>, vector<8x10xf32> -> vector<8x10xf32>
    %64 = arith.addf %39, %63 : vector<8x10xf32>
    %65 = vector.broadcast %15 : f32 to vector<8x60xf32>
    %66 = arith.mulf %5, %65 : vector<8x60xf32>
    %67 = vector.broadcast %20 : f32 to vector<8x60xf32>
    %68 = arith.mulf %7, %67 : vector<8x60xf32>
    %69 = arith.addf %66, %68 : vector<8x60xf32>
    %70 = vector.broadcast %25 : f32 to vector<8x60xf32>
    %71 = arith.mulf %9, %70 : vector<8x60xf32>
    %72 = arith.addf %69, %71 : vector<8x60xf32>
    %73 = vector.broadcast %30 : f32 to vector<8x60xf32>
    %74 = arith.mulf %11, %73 : vector<8x60xf32>
    %75 = arith.addf %72, %74 : vector<8x60xf32>
    %76 = vector.broadcast %35 : f32 to vector<8x60xf32>
    %77 = arith.mulf %13, %76 : vector<8x60xf32>
    %78 = arith.addf %75, %77 : vector<8x60xf32>
    %cst_71 = arith.constant 0.000000e+00 : f32
    %79 = vector.broadcast %cst_71 : f32 to vector<8x60xf32>
    %80 = arith.maximumf %78, %79 : vector<8x60xf32>
    %cst_72 = arith.constant dense<0.000000e+00> : vector<8x20xf32>
    %81 = tpu.matmul %80, %3, %cst_72 {dimension_numbers = #tpu.dot_dimension_numbers<[1], [0], [0], [1], [0, 0, 1, 1], [], []>} : vector<8x60xf32>, vector<60x20xf32>, vector<8x20xf32> -> vector<8x20xf32>
    %82 = vector.broadcast %1 : vector<1x20xf32> to vector<8x20xf32>
    %83 = arith.addf %81, %82 : vector<8x20xf32>
    %cst_73 = arith.constant 0.000000e+00 : f32
    %84 = vector.broadcast %cst_73 : f32 to vector<8x20xf32>
    %85 = arith.maximumf %83, %84 : vector<8x20xf32>
    %c1_74 = arith.constant 1 : index
    %c0_75 = arith.constant 0 : index
    %c0_76 = arith.constant 0 : index
    %86 = vector.load %arg3[%c1_74, %c0_75, %c0_76] : memref<5x20x10xf32, #tpu.memory_space<vmem>>, vector<1x20x10xf32>
    %87 = vector.shape_cast %86 : vector<1x20x10xf32> to vector<20x10xf32>
    %cst_77 = arith.constant dense<0.000000e+00> : vector<8x10xf32>
    %88 = tpu.matmul %85, %87, %cst_77 {dimension_numbers = #tpu.dot_dimension_numbers<[1], [0], [0], [1], [0, 0, 1, 1], [], []>} : vector<8x20xf32>, vector<20x10xf32>, vector<8x10xf32> -> vector<8x10xf32>
    %89 = arith.addf %64, %88 : vector<8x10xf32>
    %90 = vector.broadcast %16 : f32 to vector<8x60xf32>
    %91 = arith.mulf %5, %90 : vector<8x60xf32>
    %92 = vector.broadcast %21 : f32 to vector<8x60xf32>
    %93 = arith.mulf %7, %92 : vector<8x60xf32>
    %94 = arith.addf %91, %93 : vector<8x60xf32>
    %95 = vector.broadcast %26 : f32 to vector<8x60xf32>
    %96 = arith.mulf %9, %95 : vector<8x60xf32>
    %97 = arith.addf %94, %96 : vector<8x60xf32>
    %98 = vector.broadcast %31 : f32 to vector<8x60xf32>
    %99 = arith.mulf %11, %98 : vector<8x60xf32>
    %100 = arith.addf %97, %99 : vector<8x60xf32>
    %101 = vector.broadcast %36 : f32 to vector<8x60xf32>
    %102 = arith.mulf %13, %101 : vector<8x60xf32>
    %103 = arith.addf %100, %102 : vector<8x60xf32>
    %cst_78 = arith.constant 0.000000e+00 : f32
    %104 = vector.broadcast %cst_78 : f32 to vector<8x60xf32>
    %105 = arith.maximumf %103, %104 : vector<8x60xf32>
    %cst_79 = arith.constant dense<0.000000e+00> : vector<8x20xf32>
    %106 = tpu.matmul %105, %3, %cst_79 {dimension_numbers = #tpu.dot_dimension_numbers<[1], [0], [0], [1], [0, 0, 1, 1], [], []>} : vector<8x60xf32>, vector<60x20xf32>, vector<8x20xf32> -> vector<8x20xf32>
    %107 = vector.broadcast %1 : vector<1x20xf32> to vector<8x20xf32>
    %108 = arith.addf %106, %107 : vector<8x20xf32>
    %cst_80 = arith.constant 0.000000e+00 : f32
    %109 = vector.broadcast %cst_80 : f32 to vector<8x20xf32>
    %110 = arith.maximumf %108, %109 : vector<8x20xf32>
    %c2_81 = arith.constant 2 : index
    %c0_82 = arith.constant 0 : index
    %c0_83 = arith.constant 0 : index
    %111 = vector.load %arg3[%c2_81, %c0_82, %c0_83] : memref<5x20x10xf32, #tpu.memory_space<vmem>>, vector<1x20x10xf32>
    %112 = vector.shape_cast %111 : vector<1x20x10xf32> to vector<20x10xf32>
    %cst_84 = arith.constant dense<0.000000e+00> : vector<8x10xf32>
    %113 = tpu.matmul %110, %112, %cst_84 {dimension_numbers = #tpu.dot_dimension_numbers<[1], [0], [0], [1], [0, 0, 1, 1], [], []>} : vector<8x20xf32>, vector<20x10xf32>, vector<8x10xf32> -> vector<8x10xf32>
    %114 = arith.addf %89, %113 : vector<8x10xf32>
    %115 = vector.broadcast %17 : f32 to vector<8x60xf32>
    %116 = arith.mulf %5, %115 : vector<8x60xf32>
    %117 = vector.broadcast %22 : f32 to vector<8x60xf32>
    %118 = arith.mulf %7, %117 : vector<8x60xf32>
    %119 = arith.addf %116, %118 : vector<8x60xf32>
    %120 = vector.broadcast %27 : f32 to vector<8x60xf32>
    %121 = arith.mulf %9, %120 : vector<8x60xf32>
    %122 = arith.addf %119, %121 : vector<8x60xf32>
    %123 = vector.broadcast %32 : f32 to vector<8x60xf32>
    %124 = arith.mulf %11, %123 : vector<8x60xf32>
    %125 = arith.addf %122, %124 : vector<8x60xf32>
    %126 = vector.broadcast %37 : f32 to vector<8x60xf32>
    %127 = arith.mulf %13, %126 : vector<8x60xf32>
    %128 = arith.addf %125, %127 : vector<8x60xf32>
    %cst_85 = arith.constant 0.000000e+00 : f32
    %129 = vector.broadcast %cst_85 : f32 to vector<8x60xf32>
    %130 = arith.maximumf %128, %129 : vector<8x60xf32>
    %cst_86 = arith.constant dense<0.000000e+00> : vector<8x20xf32>
    %131 = tpu.matmul %130, %3, %cst_86 {dimension_numbers = #tpu.dot_dimension_numbers<[1], [0], [0], [1], [0, 0, 1, 1], [], []>} : vector<8x60xf32>, vector<60x20xf32>, vector<8x20xf32> -> vector<8x20xf32>
    %132 = vector.broadcast %1 : vector<1x20xf32> to vector<8x20xf32>
    %133 = arith.addf %131, %132 : vector<8x20xf32>
    %cst_87 = arith.constant 0.000000e+00 : f32
    %134 = vector.broadcast %cst_87 : f32 to vector<8x20xf32>
    %135 = arith.maximumf %133, %134 : vector<8x20xf32>
    %c3_88 = arith.constant 3 : index
    %c0_89 = arith.constant 0 : index
    %c0_90 = arith.constant 0 : index
    %136 = vector.load %arg3[%c3_88, %c0_89, %c0_90] : memref<5x20x10xf32, #tpu.memory_space<vmem>>, vector<1x20x10xf32>
    %137 = vector.shape_cast %136 : vector<1x20x10xf32> to vector<20x10xf32>
    %cst_91 = arith.constant dense<0.000000e+00> : vector<8x10xf32>
    %138 = tpu.matmul %135, %137, %cst_91 {dimension_numbers = #tpu.dot_dimension_numbers<[1], [0], [0], [1], [0, 0, 1, 1], [], []>} : vector<8x20xf32>, vector<20x10xf32>, vector<8x10xf32> -> vector<8x10xf32>
    %139 = arith.addf %114, %138 : vector<8x10xf32>
    %140 = vector.broadcast %18 : f32 to vector<8x60xf32>
    %141 = arith.mulf %5, %140 : vector<8x60xf32>
    %142 = vector.broadcast %23 : f32 to vector<8x60xf32>
    %143 = arith.mulf %7, %142 : vector<8x60xf32>
    %144 = arith.addf %141, %143 : vector<8x60xf32>
    %145 = vector.broadcast %28 : f32 to vector<8x60xf32>
    %146 = arith.mulf %9, %145 : vector<8x60xf32>
    %147 = arith.addf %144, %146 : vector<8x60xf32>
    %148 = vector.broadcast %33 : f32 to vector<8x60xf32>
    %149 = arith.mulf %11, %148 : vector<8x60xf32>
    %150 = arith.addf %147, %149 : vector<8x60xf32>
    %151 = vector.broadcast %38 : f32 to vector<8x60xf32>
    %152 = arith.mulf %13, %151 : vector<8x60xf32>
    %153 = arith.addf %150, %152 : vector<8x60xf32>
    %cst_92 = arith.constant 0.000000e+00 : f32
    %154 = vector.broadcast %cst_92 : f32 to vector<8x60xf32>
    %155 = arith.maximumf %153, %154 : vector<8x60xf32>
    %cst_93 = arith.constant dense<0.000000e+00> : vector<8x20xf32>
    %156 = tpu.matmul %155, %3, %cst_93 {dimension_numbers = #tpu.dot_dimension_numbers<[1], [0], [0], [1], [0, 0, 1, 1], [], []>} : vector<8x60xf32>, vector<60x20xf32>, vector<8x20xf32> -> vector<8x20xf32>
    %157 = vector.broadcast %1 : vector<1x20xf32> to vector<8x20xf32>
    %158 = arith.addf %156, %157 : vector<8x20xf32>
    %cst_94 = arith.constant 0.000000e+00 : f32
    %159 = vector.broadcast %cst_94 : f32 to vector<8x20xf32>
    %160 = arith.maximumf %158, %159 : vector<8x20xf32>
    %c4_95 = arith.constant 4 : index
    %c0_96 = arith.constant 0 : index
    %c0_97 = arith.constant 0 : index
    %161 = vector.load %arg3[%c4_95, %c0_96, %c0_97] : memref<5x20x10xf32, #tpu.memory_space<vmem>>, vector<1x20x10xf32>
    %162 = vector.shape_cast %161 : vector<1x20x10xf32> to vector<20x10xf32>
    %cst_98 = arith.constant dense<0.000000e+00> : vector<8x10xf32>
    %163 = tpu.matmul %160, %162, %cst_98 {dimension_numbers = #tpu.dot_dimension_numbers<[1], [0], [0], [1], [0, 0, 1, 1], [], []>} : vector<8x20xf32>, vector<20x10xf32>, vector<8x10xf32> -> vector<8x10xf32>
    %164 = arith.addf %139, %163 : vector<8x10xf32>
    %165 = vector.broadcast %2 : vector<1x10xf32> to vector<8x10xf32>
    %166 = arith.addf %164, %165 : vector<8x10xf32>
    %cst_99 = arith.constant 0.000000e+00 : f32
    %167 = vector.broadcast %cst_99 : f32 to vector<8x10xf32>
    %168 = arith.maximumf %166, %167 : vector<8x10xf32>
    %c0_100 = arith.constant 0 : index
    %c0_101 = arith.constant 0 : index
    %169 = vector.load %arg9[%c0_100, %c0_101] : memref<8x10xf32, #tpu.memory_space<vmem>>, vector<8x10xf32>
    tpu.vector_store %arg9[%c0_100, %c0_101], %168 {strides = array<i32>} : memref<8x10xf32, #tpu.memory_space<vmem>>, vector<8x10xf32>,
    %c0_102 = arith.constant 0 : index
    %c0_103 = arith.constant 0 : index
    %170 = vector.load %arg5[%c0_102, %c0_103] : memref<10x128xf32, #tpu.memory_space<vmem>>, vector<10x128xf32>
    %cst_104 = arith.constant dense<0.000000e+00> : vector<8x128xf32>
    %171 = tpu.matmul %168, %170, %cst_104 {dimension_numbers = #tpu.dot_dimension_numbers<[1], [0], [0], [1], [0, 0, 1, 1], [], []>} : vector<8x10xf32>, vector<10x128xf32>, vector<8x128xf32> -> vector<8x128xf32>
    %172 = arith.mulf %168, %168 : vector<8x10xf32>
    %cst_105 = arith.constant dense<0.000000e+00> : vector<8xf32>
    %173 = vector.multi_reduction <add>, %172, %cst_105 [1] : vector<8x10xf32> to vector<8xf32>
    %174 = vector.shape_cast %173 : vector<8xf32> to vector<8x1xf32>
    %cst_106 = arith.constant 0.000000e+00 : f32
    %175 = vector.broadcast %cst_106 : f32 to vector<8x1xf32>
    %176 = arith.cmpf ogt, %174, %175 : vector<8x1xf32>
    %177 = math.rsqrt %174 : vector<8x1xf32>
    %cst_107 = arith.constant 0.000000e+00 : f32
    %178 = vector.broadcast %cst_107 : f32 to vector<8x1xf32>
    %179 = arith.select %176, %177, %178 : vector<8x1xi1>, vector<8x1xf32>
    %180 = vector.broadcast %179 : vector<8x1xf32> to vector<8x128xf32>
    %181 = arith.mulf %171, %180 : vector<8x128xf32>
    %c0_108 = arith.constant 0 : index
    %c0_109 = arith.constant 0 : index
    %182 = vector.load %arg6[%c0_108, %c0_109] : memref<1x128xf32, #tpu.memory_space<vmem>>, vector<1x128xf32>
    %183 = vector.broadcast %182 : vector<1x128xf32> to vector<8x128xf32>
    %184 = arith.mulf %181, %183 : vector<8x128xf32>
    %c0_110 = arith.constant 0 : index
    %c0_111 = arith.constant 0 : index
    %185 = vector.load %arg7[%c0_110, %c0_111] : memref<1x128xf32, #tpu.memory_space<vmem>>, vector<1x128xf32>
    %186 = vector.broadcast %185 : vector<1x128xf32> to vector<8x128xf32>
    %187 = arith.addf %184, %186 : vector<8x128xf32>
    %c0_112 = arith.constant 0 : index
    %c0_113 = arith.constant 0 : index
    %188 = vector.load %arg8[%c0_112, %c0_113] : memref<8x128xf32, #tpu.memory_space<vmem>>, vector<8x128xf32>
    tpu.vector_store %arg8[%c0_112, %c0_113], %187 {strides = array<i32>} : memref<8x128xf32, #tpu.memory_space<vmem>>, vector<8x128xf32>,
    return
  }
}

module attributes {stable_mosaic.version = 11 : i64} {
  func.func @_gnn_kernel(%arg0: memref<8x5xi32, #tpu.memory_space<vmem>>, %arg1: memref<128x15xf32, #tpu.memory_space<vmem>>, %arg2: memref<8x10xf32, #tpu.memory_space<vmem>>, %arg3: memref<10x15xf32, #tpu.memory_space<vmem>>, %arg4: memref<15x10xf32, #tpu.memory_space<vmem>>, %arg5: memref<15x10xf32, #tpu.memory_space<vmem>>, %arg6: memref<10x3xf32, #tpu.memory_space<vmem>>, %arg7: memref<3x15xf32, #tpu.memory_space<vmem>>, %arg8: memref<8x3xf32, #tpu.memory_space<vmem>>) attributes {dimension_semantics = [], scalar_prefetch = 0 : i64, scratch_operands = 0 : i64, tpu.core_type = #tpu.core_type<tc>} {
    %c0 = arith.constant 0 : index
    %c0_0 = arith.constant 0 : index
    %0 = vector.load %arg7[%c0, %c0_0] : memref<3x15xf32, #tpu.memory_space<vmem>>, vector<3x15xf32>
    %1 = vector.extract_strided_slice %0 {offsets = [0, 0], sizes = [1, 15], strides = [1, 1]} : vector<3x15xf32> to vector<1x15xf32>
    %2 = vector.extract_strided_slice %0 {offsets = [1, 0], sizes = [1, 10], strides = [1, 1]} : vector<3x15xf32> to vector<1x10xf32>
    %3 = vector.extract_strided_slice %0 {offsets = [2, 0], sizes = [1, 3], strides = [1, 1]} : vector<3x15xf32> to vector<1x3xf32>
    %c0_1 = arith.constant 0 : index
    %c0_2 = arith.constant 0 : index
    %4 = vector.load %arg0[%c0_1, %c0_2] : memref<8x5xi32, #tpu.memory_space<vmem>>, vector<8x5xi32>
    %5 = tpu.iota {dimensions = array<i32: 1>} : vector<8x128xi32>
    %cst = arith.constant 0.000000e+00 : f32
    %6 = vector.broadcast %cst : f32 to vector<8x128xf32>
    %7 = vector.extract_strided_slice %4 {offsets = [0, 0], sizes = [8, 1], strides = [1, 1]} : vector<8x5xi32> to vector<8x1xi32>
    %8 = vector.broadcast %7 : vector<8x1xi32> to vector<8x128xi32>
    %9 = arith.cmpi eq, %5, %8 : vector<8x128xi32>
    %cst_3 = arith.constant 1.000000e+00 : f32
    %cst_4 = arith.constant 0.000000e+00 : f32
    %10 = vector.broadcast %cst_3 : f32 to vector<8x128xf32>
    %11 = vector.broadcast %cst_4 : f32 to vector<8x128xf32>
    %12 = arith.select %9, %10, %11 : vector<8x128xi1>, vector<8x128xf32>
    %13 = arith.addf %6, %12 : vector<8x128xf32>
    %14 = vector.extract_strided_slice %4 {offsets = [0, 1], sizes = [8, 1], strides = [1, 1]} : vector<8x5xi32> to vector<8x1xi32>
    %15 = vector.broadcast %14 : vector<8x1xi32> to vector<8x128xi32>
    %16 = arith.cmpi eq, %5, %15 : vector<8x128xi32>
    %cst_5 = arith.constant 1.000000e+00 : f32
    %cst_6 = arith.constant 0.000000e+00 : f32
    %17 = vector.broadcast %cst_5 : f32 to vector<8x128xf32>
    %18 = vector.broadcast %cst_6 : f32 to vector<8x128xf32>
    %19 = arith.select %16, %17, %18 : vector<8x128xi1>, vector<8x128xf32>
    %20 = arith.addf %13, %19 : vector<8x128xf32>
    %21 = vector.extract_strided_slice %4 {offsets = [0, 2], sizes = [8, 1], strides = [1, 1]} : vector<8x5xi32> to vector<8x1xi32>
    %22 = vector.broadcast %21 : vector<8x1xi32> to vector<8x128xi32>
    %23 = arith.cmpi eq, %5, %22 : vector<8x128xi32>
    %cst_7 = arith.constant 1.000000e+00 : f32
    %cst_8 = arith.constant 0.000000e+00 : f32
    %24 = vector.broadcast %cst_7 : f32 to vector<8x128xf32>
    %25 = vector.broadcast %cst_8 : f32 to vector<8x128xf32>
    %26 = arith.select %23, %24, %25 : vector<8x128xi1>, vector<8x128xf32>
    %27 = arith.addf %20, %26 : vector<8x128xf32>
    %28 = vector.extract_strided_slice %4 {offsets = [0, 3], sizes = [8, 1], strides = [1, 1]} : vector<8x5xi32> to vector<8x1xi32>
    %29 = vector.broadcast %28 : vector<8x1xi32> to vector<8x128xi32>
    %30 = arith.cmpi eq, %5, %29 : vector<8x128xi32>
    %cst_9 = arith.constant 1.000000e+00 : f32
    %cst_10 = arith.constant 0.000000e+00 : f32
    %31 = vector.broadcast %cst_9 : f32 to vector<8x128xf32>
    %32 = vector.broadcast %cst_10 : f32 to vector<8x128xf32>
    %33 = arith.select %30, %31, %32 : vector<8x128xi1>, vector<8x128xf32>
    %34 = arith.addf %27, %33 : vector<8x128xf32>
    %35 = vector.extract_strided_slice %4 {offsets = [0, 4], sizes = [8, 1], strides = [1, 1]} : vector<8x5xi32> to vector<8x1xi32>
    %36 = vector.broadcast %35 : vector<8x1xi32> to vector<8x128xi32>
    %37 = arith.cmpi eq, %5, %36 : vector<8x128xi32>
    %cst_11 = arith.constant 1.000000e+00 : f32
    %cst_12 = arith.constant 0.000000e+00 : f32
    %38 = vector.broadcast %cst_11 : f32 to vector<8x128xf32>
    %39 = vector.broadcast %cst_12 : f32 to vector<8x128xf32>
    %40 = arith.select %37, %38, %39 : vector<8x128xi1>, vector<8x128xf32>
    %41 = arith.addf %34, %40 : vector<8x128xf32>
    %cst_13 = arith.constant dense<0.000000e+00> : vector<8xf32>
    %42 = vector.multi_reduction <add>, %41, %cst_13 [1] : vector<8x128xf32> to vector<8xf32>
    %43 = vector.shape_cast %42 : vector<8xf32> to vector<8x1xf32>
    %cst_14 = arith.constant 0.000000e+00 : f32
    %44 = vector.broadcast %cst_14 : f32 to vector<8x1xf32>
    %45 = arith.cmpf ogt, %43, %44 : vector<8x1xf32>
    %cst_15 = arith.constant 1.000000e+00 : f32
    %46 = vector.broadcast %cst_15 : f32 to vector<8x1xf32>
    %47 = arith.select %45, %43, %46 : vector<8x1xi1>, vector<8x1xf32>
    %48 = vector.broadcast %47 : vector<8x1xf32> to vector<8x128xf32>
    %49 = arith.divf %41, %48 : vector<8x128xf32>
    %c0_16 = arith.constant 0 : index
    %c0_17 = arith.constant 0 : index
    %50 = vector.load %arg1[%c0_16, %c0_17] : memref<128x15xf32, #tpu.memory_space<vmem>>, vector<128x15xf32>
    %cst_18 = arith.constant dense<0.000000e+00> : vector<8x15xf32>
    %51 = tpu.matmul %49, %50, %cst_18 {dimension_numbers = #tpu.dot_dimension_numbers<[1], [0], [0], [1], [0, 0, 1, 1], [], []>} : vector<8x128xf32>, vector<128x15xf32>, vector<8x15xf32> -> vector<8x15xf32>
    %c0_19 = arith.constant 0 : index
    %c0_20 = arith.constant 0 : index
    %52 = vector.load %arg2[%c0_19, %c0_20] : memref<8x10xf32, #tpu.memory_space<vmem>>, vector<8x10xf32>
    %c0_21 = arith.constant 0 : index
    %c0_22 = arith.constant 0 : index
    %53 = vector.load %arg3[%c0_21, %c0_22] : memref<10x15xf32, #tpu.memory_space<vmem>>, vector<10x15xf32>
    %cst_23 = arith.constant dense<0.000000e+00> : vector<8x15xf32>
    %54 = tpu.matmul %52, %53, %cst_23 {dimension_numbers = #tpu.dot_dimension_numbers<[1], [0], [0], [1], [0, 0, 1, 1], [], []>} : vector<8x10xf32>, vector<10x15xf32>, vector<8x15xf32> -> vector<8x15xf32>
    %55 = vector.broadcast %1 : vector<1x15xf32> to vector<8x15xf32>
    %56 = arith.addf %54, %55 : vector<8x15xf32>
    %cst_24 = arith.constant 0.000000e+00 : f32
    %57 = vector.broadcast %cst_24 : f32 to vector<8x15xf32>
    %58 = arith.maximumf %56, %57 : vector<8x15xf32>
    %c0_25 = arith.constant 0 : index
    %c0_26 = arith.constant 0 : index
    %59 = vector.load %arg4[%c0_25, %c0_26] : memref<15x10xf32, #tpu.memory_space<vmem>>, vector<15x10xf32>
    %cst_27 = arith.constant dense<0.000000e+00> : vector<8x10xf32>
    %60 = tpu.matmul %51, %59, %cst_27 {dimension_numbers = #tpu.dot_dimension_numbers<[1], [0], [0], [1], [0, 0, 1, 1], [], []>} : vector<8x15xf32>, vector<15x10xf32>, vector<8x10xf32> -> vector<8x10xf32>
    %61 = vector.broadcast %2 : vector<1x10xf32> to vector<8x10xf32>
    %62 = arith.addf %60, %61 : vector<8x10xf32>
    %c0_28 = arith.constant 0 : index
    %c0_29 = arith.constant 0 : index
    %63 = vector.load %arg5[%c0_28, %c0_29] : memref<15x10xf32, #tpu.memory_space<vmem>>, vector<15x10xf32>
    %cst_30 = arith.constant dense<0.000000e+00> : vector<8x10xf32>
    %64 = tpu.matmul %58, %63, %cst_30 {dimension_numbers = #tpu.dot_dimension_numbers<[1], [0], [0], [1], [0, 0, 1, 1], [], []>} : vector<8x15xf32>, vector<15x10xf32>, vector<8x10xf32> -> vector<8x10xf32>
    %65 = arith.addf %62, %64 : vector<8x10xf32>
    %c0_31 = arith.constant 0 : index
    %c0_32 = arith.constant 0 : index
    %66 = vector.load %arg6[%c0_31, %c0_32] : memref<10x3xf32, #tpu.memory_space<vmem>>, vector<10x3xf32>
    %cst_33 = arith.constant dense<0.000000e+00> : vector<8x3xf32>
    %67 = tpu.matmul %65, %66, %cst_33 {dimension_numbers = #tpu.dot_dimension_numbers<[1], [0], [0], [1], [0, 0, 1, 1], [], []>} : vector<8x10xf32>, vector<10x3xf32>, vector<8x3xf32> -> vector<8x3xf32>
    %68 = vector.broadcast %3 : vector<1x3xf32> to vector<8x3xf32>
    %69 = arith.addf %67, %68 : vector<8x3xf32>
    %cst_34 = arith.constant dense<0xFF800000> : vector<8xf32>
    %70 = vector.multi_reduction <maximumf>, %69, %cst_34 [1] : vector<8x3xf32> to vector<8xf32>
    %71 = vector.shape_cast %70 : vector<8xf32> to vector<8x1xf32>
    %72 = vector.broadcast %71 : vector<8x1xf32> to vector<8x3xf32>
    %73 = arith.subf %69, %72 : vector<8x3xf32>
    %74 = math.exp %73 : vector<8x3xf32>
    %cst_35 = arith.constant dense<0.000000e+00> : vector<8xf32>
    %75 = vector.multi_reduction <add>, %74, %cst_35 [1] : vector<8x3xf32> to vector<8xf32>
    %76 = vector.shape_cast %75 : vector<8xf32> to vector<8x1xf32>
    %77 = vector.broadcast %76 : vector<8x1xf32> to vector<8x3xf32>
    %78 = arith.divf %74, %77 : vector<8x3xf32>
    %c0_36 = arith.constant 0 : index
    %c0_37 = arith.constant 0 : index
    %79 = vector.load %arg8[%c0_36, %c0_37] : memref<8x3xf32, #tpu.memory_space<vmem>>, vector<8x3xf32>
    tpu.vector_store %arg8[%c0_36, %c0_37], %78 {strides = array<i32>} : memref<8x3xf32, #tpu.memory_space<vmem>>, vector<8x3xf32>,
    return
  }
}

</mosaic_0001>

<bundles_post_ra>
// kernel: gnntest_forward.2
= control target key start
LH: loop header
LB: loop body
LE: loop exit
PB: predicated region body
PF: predicated region fallthrough
CT: control target
= control target key end

     0   :  { %15 = vsyncpa [#allocation3], 0  ;;  %s1802_s0 = inlined_call_operand.vmem [shape: f32[5,8,60], index: 0, kind: input, shape index: {}]   ;;  %s1803_s1 = inlined_call_operand.vmem [shape: f32[5,5], index: 1, kind: input, shape index: {}]   ;;  %s1804_s2 = inlined_call_operand.vmem [shape: f32[60,20], index: 2, kind: input, shape index: {}]   ;;  %s1805_s3 = inlined_call_operand.vmem [shape: f32[5,20,10], index: 3, kind: input, shape index: {}]   ;;  %s1806_s4 = inlined_call_operand.vmem [shape: f32[2,20], index: 4, kind: input, shape index: {}]   ;;  %s1807_s5 = inlined_call_operand.vmem [shape: f32[10,128], index: 5, kind: input, shape index: {}]   ;;  %s1808_s6 = inlined_call_operand.vmem [shape: f32[1,128], index: 6, kind: input, shape index: {}]   ;;  %s1809_s7 = inlined_call_operand.vmem [shape: f32[1,128], index: 7, kind: input, shape index: {}]   ;;  %s1810_s8 = inlined_call_operand.vmem [shape: f32[8,128], index: 8, kind: output, shape index: {0}]   ;;  %s1811_s9 = inlined_call_operand.vmem [shape: f32[8,10], index: 9, kind: output, shape index: {1}]  }
   0x1   :  { %s24_s11 = sshll.u32 %s1803_s1, 4  ;;  %s25_s11 = int_to_ptr.vmem [resolvable:$true] %s24_s11 }
   0x2   :  { %s1435_s12 = scalar_lea.vmem %s25_s11, 128  ;;  %p1440_p1 = scmp.lt.s32.totalorder %s25_s11, %s25_s11 }
   0x3   :  { %p1436_p0 = scmp.ne.s32.totalorder %s25_s11, %s1435_s12  ;;  %p1441_p2 = scmp.lt.s32.totalorder %s1435_s12, %s1435_s12 }
   0x5   :  { %p1442_p3 = por %p1441_p2, %p1440_p1 }
   0x7   :  { %p1443_p4 = pnand %p1442_p3, %p1436_p0 }
   0x9   :  { %1446 = shalt.err (!%p1443_p4)
}
   0xa   :  { %s1449_s13 = smov [#allocation2]  }
   0xb   :  { %27 = dma.vmem_to_smem %s25_s11, 128, %s1449_s13, [#allocation3]  }
   0xc   :  { %1447 = dma.done.wait [#allocation3], 128  }
   0xd   :  { %1448 = vsyncadd [#allocation3], 4294967168 }
   0xe   :  { %43 = sfence }
   0xf   :  { %v45_v0 = vld [vmem:[%s1804_s2] sm:$0xff]  ;;  %v46_v1 = vld [vmem:[%s1804_s2 + $0x8] sm:$0xff]  ;;  %v47_v2 = vld [vmem:[%s1804_s2 + $0x10] sm:$0xff]  ;;  %v1450_v3 = vmov 0.0|0.0   ;;  %vm1451_vm0 = vmmov 0   ;;  %v1452_v6 = vmov 0.0   ;;  %v102_v58 = vlaneseq }
  0x10   :  { %1344 = vmatprep.subr.bf16.mxu0 %v1450_v3  ;;  %1357 = vmatprep.subr.bf16.mxu1 %v1450_v3  ;;  %v1518_v4 = vpack.c.bf16 %v46_v1, %v45_v0  ;;  %v48_v5 = vld [vmem:[%s1804_s2 + $0x18] sm:$0xff]  ;;  %s1527_s21 = sld [smem:[#allocation2]]  ;;  %v49_v8 = vld [vmem:[%s1804_s2 + $0x20] sm:$0xff]  ;;  %v50_v9 = vld [vmem:[%s1804_s2 + $0x28] sm:$0xff]  ;;  %s1547_s30 = sld [smem:[#allocation2 + $0x1]]  ;;  %vm110_vm1 = vcmask 1043456  }
  0x11   :  { %1213 = vmatprep.mubr.msk.f32.mxu0 %vm1451_vm0, %v1452_v6  ;;  %1232 = vmatprep.mubr.msk.f32.mxu1 %vm1451_vm0, %v1452_v6  ;;  %v1531_v7 = vpack.c.bf16 %v48_v5, %v47_v2  ;;  %s1073_s22 = sld [smem:[#allocation2 + $0x80]]  ;;  %v1552_v10 = vld [vmem:[%s1802_s0] sm:$0xff]  ;;  %s1554_s12 = sld [smem:[#allocation2 + $0x81]]  ;;  %v1560_v11 = vpack.c.bf16 %v50_v9, %v49_v8  ;;  %v1565_v12 = vld [vmem:[%s1802_s0 + $0x8] sm:$0xff]  ;;  %v51_v13 = vld [vmem:[%s1804_s2 + $0x30] sm:$0xff]  ;;  %vm1453_vm2 = vmmov 1  }
  0x12   :  { %1346 = vmatpush3.bf16.msra.mxu0 %v1518_v4  ;;  %1359 = vmatpush3.bf16.msra.mxu1 %v1518_v4  ;;  %s1541_s27 = sld [smem:[#allocation2 + $0x100]]  ;;  %s1556_s13 = sld [smem:[#allocation2 + $0x101]]  ;;  %v52_v14 = vld [vmem:[%s1804_s2 + $0x38] sm:$0xf]  ;;  %v1582_v15 = vld [vmem:[%s1802_s0 + $0x10] sm:$0xff]  ;;  %v1601_v24 = vld [vmem:[%s1802_s0 + $0x20] sm:$0xff] }
  0x13   :  { %1347 = vmatprep.subr.bf16.mxu0 %v1450_v3  ;;  %1360 = vmatprep.subr.bf16.mxu1 %v1450_v3  ;;  %s1543_s28 = sld [smem:[#allocation2 + $0x180]]  ;;  %s1567_s16 = sld [smem:[#allocation2 + $0x181]]  ;;  %v1588_v17 = vld [vmem:[%s1802_s0 + $0x18] sm:$0xff]  ;;  %v1596_v23 = vpack.c.bf16 %v52_v14, %v51_v13  ;;  %vm1610_vm3 = vmpackc.low %vm110_vm1, %vm1453_vm2  ;;  %v1098_v44 = vld [vmem:[%s1805_s3 + $0x20] sm:$0xff]  ;;  %vm106_vm4 = vcmask 490496   ;;  %v1663_v59 = vshrl.u32 %v102_v58, 7 }
  0x14   :  { %s1545_s29 = sld [smem:[#allocation2 + $0x200]]  ;;  %s1569_s17 = sld [smem:[#allocation2 + $0x201]]  ;;  %v1097_v43 = vld [vmem:[%s1805_s3 + $0x18] sm:$0xff]  ;;  %v185_v53 = vld [vmem:[%s1805_s3] sm:$0xff]  ;;  %v186_v54 = vld [vmem:[%s1805_s3 + $0x8] sm:$0xff]  ;;  %vm281_vm5 = vcmask 162816  }
  0x15   :  { %v1371_v49 = vpack.c.bf16 %v1098_v44, %v1097_v43  ;;  %v1374_v55 = vpack.c.bf16 %v186_v54, %v185_v53  ;;  %v1099_v56 = vld [vmem:[%s1805_s3 + $0x28] sm:$0xf]  ;;  %v187_v57 = vld [vmem:[%s1805_s3 + $0x10] sm:$0xf]  ;;  %v104_v60 = vsub.s32 0, %v1663_v59  ;;  %s1080_s1 = sld [smem:[#allocation2 + $0x102]] }
  0x16   :  { %1349 = vmatpush3.bf16.msra.mxu0 %v1531_v7  ;;  %1362 = vmatpush3.bf16.msra.mxu1 %v1531_v7  ;;  %v87_v16 = vstv %s1527_s21  ;;  %v188_v27 = vstv %s1547_s30  ;;  %v1669_v61 = vld [vmem:[%s1806_s4] sm:$0x3]  ;;  %s1085_s20 = sld [smem:[#allocation2 + $0x182]]  ;;  %s1071_s0 = sld [smem:[#allocation2 + $0x3]]  ;;  %vm957_vm6 = vcmask 1041408   ;;  %vm950_vm8 = vcmask 80896  }
  0x17   :  { %1350 = vmatprep.subr.bf16.mxu0 %v1450_v3  ;;  %1363 = vmatprep.subr.bf16.mxu1 %v1450_v3  ;;  %v88_v18 = vmul.f32 %v87_v16, %v1552_v10  ;;  %v89_v19 = vstv %s1073_s22  ;;  %v189_v31 = vmul.f32 %v188_v27, %v1552_v10  ;;  %v190_v32 = vstv %s1554_s12  ;;  %s1090_s23 = sld [smem:[#allocation2 + $0x202]]  ;;  %s1076_s22 = sld [smem:[#allocation2 + $0x83]]  ;;  %vm1426_vm7 = vmpackc.low %vm957_vm6, %vm1453_vm2 }
  0x18   :  { %v90_v20 = vmul.f32 %v1565_v12, %v89_v19  ;;  %v92_v21 = vstv %s1541_s27  ;;  %v191_v33 = vmul.f32 %v1565_v12, %v190_v32  ;;  %v193_v34 = vstv %s1556_s13  ;;  %s1081_s27 = sld [smem:[#allocation2 + $0x103]]  ;;  %s1072_s15 = sld [smem:[#allocation2 + $0x4]] }
  0x19   :  { %v95_v22 = vstv %s1543_s28  ;;  %v93_v25 = vmul.f32 %v1582_v15, %v92_v21  ;;  %v196_v35 = vstv %s1567_s16  ;;  %v194_v38 = vmul.f32 %v1582_v15, %v193_v34  ;;  %s1070_s16 = sld [smem:[#allocation2 + $0x2]]  ;;  %v1106_v34 = vld [vmem:[%s1805_s3 + $0x30] sm:$0xff]  ;;  %s1086_s28 = sld [smem:[#allocation2 + $0x183]] }
  0x1a   :  { %1352 = vmatpush3.bf16.msra.mxu0 %v1560_v11  ;;  %1365 = vmatpush3.bf16.msra.mxu1 %v1560_v11  ;;  %v98_v26 = vstv %s1545_s29  ;;  %v91_v29 = vadd.f32 %v90_v20, %v88_v18  ;;  %v96_v30 = vmul.f32 %v1588_v17, %v95_v22  ;;  %v199_v39 = vstv %s1569_s17  ;;  %s1075_s17 = sld [smem:[#allocation2 + $0x82]]  ;;  %s1091_s29 = sld [smem:[#allocation2 + $0x203]] }
  0x1b   :  { %1353 = vmatprep.subr.bf16.mxu0 %v1450_v3  ;;  %1366 = vmatprep.subr.bf16.mxu1 %v1450_v3  ;;  %v99_v37 = vmul.f32 %v1601_v24, %v98_v26  ;;  %v192_v40 = vadd.f32 %v191_v33, %v189_v31  ;;  %v197_v41 = vmul.f32 %v1588_v17, %v196_v35  ;;  %v439_v9 = vstv %s1080_s1  ;;  %v1107_v35 = vld [vmem:[%s1805_s3 + $0x38] sm:$0xff]  ;;  %s1087_s1 = sld [smem:[#allocation2 + $0x184]] }
  0x1c   :  { %v94_v36 = vadd.f32 %v93_v25, %v91_v29  ;;  %v200_v46 = vmul.f32 %v1601_v24, %v199_v39  ;;  %v1672_v62 = vrot.slane %v1669_v61, %v104_v60  ;;  %v440_v21 = vmul.f32 %v1582_v15, %v439_v9  ;;  %s1092_s18 = sld [smem:[#allocation2 + $0x204]] }
  0x1d   :  { %v195_v45 = vadd.f32 %v194_v38, %v192_v40  ;;  %v442_v22 = vstv %s1085_s20  ;;  %v445_v29 = vstv %s1090_s23  ;;  %v604_v43 = vstv %s1071_s0 }
  0x1e   :  { %1356 = vmatpush3.bf16.msk.msra.mxu0 %vm1610_vm3, %v1596_v23  ;;  %1369 = vmatpush3.bf16.msk.msra.mxu1 %vm1610_vm3, %v1596_v23  ;;  %v97_v42 = vadd.f32 %v96_v30, %v94_v36  ;;  %v443_v27 = vmul.f32 %v1588_v17, %v442_v22  ;;  %v446_v31 = vmul.f32 %v1601_v24, %v445_v29  ;;  %v606_v44 = vstv %s1076_s22 }
  0x1f   :  { %1370 = vmatprep.subr.bf16.mxu0 %v1450_v3  ;;  %1373 = vmatprep.subr.bf16.mxu1 %v1450_v3  ;;  %v198_v48 = vadd.f32 %v197_v41, %v195_v45  ;;  %v434_v63 = vstv %s1070_s16  ;;  %v1390_v36 = vpack.c.bf16 %v1107_v35, %v1106_v34  ;;  %v605_v45 = vmul.f32 %v604_v43, %v1552_v10  ;;  %s1077_s16 = sld [smem:[#allocation2 + $0x84]] }
  0x20   :  { %v100_v47 = vadd.f32 %v99_v37, %v97_v42  ;;  %v436_v0 = vstv %s1075_s17  ;;  %v435_v2 = vmul.f32 %v434_v63, %v1552_v10  ;;  %v1108_v37 = vld [vmem:[%s1805_s3 + $0x40] sm:$0xf]  ;;  %v612_v53 = vstv %s1086_s28  ;;  %s1082_s17 = sld [smem:[#allocation2 + $0x104]] }
  0x21   :  { %v201_v51 = vadd.f32 %v200_v46, %v198_v48  ;;  %v437_v5 = vmul.f32 %v1565_v12, %v436_v0  ;;  %v607_v46 = vmul.f32 %v1565_v12, %v606_v44 }
  0x22   :  { %v101_v50 = vmax.f32 %v100_v47, 0.0  ;;  %v609_v47 = vstv %s1081_s27 }
  0x23   :  { %v202_v52 = vmax.f32 %v201_v51, 0.0  ;;  %v438_v20 = vadd.f32 %v437_v5, %v435_v2  ;;  %v608_v51 = vadd.f32 %v607_v46, %v605_v45  ;;  %v1114_v2 = vld [vmem:[%s1805_s3 + $0x50] sm:$0xff] }
  0x24   :  { %1214 = vmatmul.mubr.msk.f32.vlgmr.msra.gmra.mrb[0].mxu0 %vm106_vm4, %v101_v50 }
  0x25   :  { %1372 = vmatpush3.bf16.msra.mxu0 %v1371_v49  ;;  %1241 = vmatprep.mubr.msk.f32.mxu0 %vm1451_vm0, %v1452_v6  ;;  %v441_v26 = vadd.f32 %v440_v21, %v438_v20 }
  0x26   :  { %1239 = vmatprep.subr.mxu0 %v1452_v6  ;;  %1233 = vmatmul.mubr.msk.f32.vlgmr.msra.gmra.mrb[0].mxu1 %vm106_vm4, %v202_v52  ;;  %v610_v52 = vmul.f32 %v1582_v15, %v609_v47  ;;  %v779_v21 = vstv %s1082_s17 }
  0x27   :  { %1250 = vmatprep.mubr.msk.f32.mxu1 %vm1451_vm0, %v1452_v6  ;;  %1375 = vmatpush3.bf16.msra.mxu1 %v1374_v55  ;;  %v444_v30 = vadd.f32 %v443_v27, %v441_v26  ;;  %v780_v29 = vmul.f32 %v1582_v15, %v779_v21 }
  0x28   :  { %1248 = vmatprep.subr.mxu1 %v1452_v6  ;;  %v611_v55 = vadd.f32 %v610_v52, %v608_v51  ;;  %v1127_v51 = vld [vmem:[%s1808_s6] ss:$0 sm:$0xff] }
  0x29   :  { %1240 = vmatpush3.msk.msra.mxu0 %vm110_vm1, %v1099_v56  ;;  %v447_v32 = vadd.f32 %v446_v31, %v444_v30  ;;  %v613_v56 = vmul.f32 %v1588_v17, %v612_v53  ;;  %v782_v30 = vstv %s1087_s1 }
  0x2a   :  { %1376 = vmatprep.subr.bf16.mxu0 %v1450_v3 }
  0x2b   :  { %1249 = vmatpush3.msk.msra.mxu1 %vm110_vm1, %v187_v57  ;;  %v448_v33 = vmax.f32 %v447_v32, 0.0  ;;  %v615_v57 = vstv %s1091_s29  ;;  %v614_v58 = vadd.f32 %v613_v56, %v611_v55 }
  0x2c   :  { %1389 = vmatprep.subr.bf16.mxu1 %v1450_v3  ;;  %v616_v60 = vmul.f32 %v1601_v24, %v615_v57 }
  0x2e   :  { %v617_v63 = vadd.f32 %v616_v60, %v614_v58 }
  0x30   :  { %v618_v0 = vmax.f32 %v617_v63, 0.0 }
  0xf7   :  { %v180_v1 = vpop.f32.mrb[0].mxu0 }
  0xf8   :  { %v181_v8 = vadd.f32 %v180_v1, %v1672_v62  ;;  %v1215_v13 = vpop.f32.mrb[1].mxu0  ;;  %v1113_v1 = vld [vmem:[%s1805_s3 + $0x48] sm:$0xff] }
  0xf9   :  { %v272_v16 = vpop.f32.mrb[0].mxu1  ;;  %v1406_v5 = vpack.c.bf16 %v1114_v2, %v1113_v1 }
  0xfa   :  { %v184_v14 = vmax.f32 %v181_v8, 0.0  ;;  %v273_v18 = vadd.f32 %v272_v16, %v1672_v62  ;;  %v1234_v19 = vpop.f32.mrb[1].mxu1  ;;  %v1115_v8 = vld [vmem:[%s1805_s3 + $0x58] sm:$0xf]  ;;  %v774_v16 = vstv %s1072_s15 }
  0xfb   :  { %v775_v19 = vmul.f32 %v774_v16, %v1552_v10  ;;  %v785_v10 = vstv %s1092_s18 }
  0xfc   :  { %1251 = vmatmul.mubr.msk.f32.vlgmr.msra.gmra.mrb[2].mxu1 %vm281_vm5, %v184_v14  ;;  %v276_v25 = vmax.f32 %v273_v18, 0.0  ;;  %v776_v18 = vstv %s1077_s16  ;;  %v786_v34 = vmul.f32 %v1601_v24, %v785_v10 }
  0xfd   :  { %1278 = vmatprep.mubr.msk.f32.mxu1 %vm1451_vm0, %v1452_v6  ;;  %1391 = vmatpush3.bf16.msra.mxu1 %v1390_v36  ;;  %v777_v20 = vmul.f32 %v1565_v12, %v776_v18 }
  0xfe   :  { %1242 = vmatmul.mubr.msk.f32.vlgmr.msra.gmra.mrb[2].mxu0 %vm281_vm5, %v276_v25  ;;  %1276 = vmatprep.subr.mxu1 %v1452_v6 }
  0xff   :  { %1378 = vmatpush3.bf16.msra.mxu0 %v1518_v4  ;;  %1269 = vmatprep.mubr.msk.f32.mxu0 %vm1451_vm0, %v1452_v6  ;;  %v778_v27 = vadd.f32 %v777_v20, %v775_v19 }
 0x100   :  { %1379 = vmatprep.subr.bf16.mxu0 %v1450_v3 }
 0x101   :  { %1277 = vmatpush3.msk.msra.mxu1 %vm110_vm1, %v1108_v37  ;;  %v781_v32 = vadd.f32 %v780_v29, %v778_v27 }
 0x102   :  { %1392 = vmatprep.subr.bf16.mxu1 %v1450_v3 }
 0x103   :  { %1381 = vmatpush3.bf16.msra.mxu0 %v1531_v7 }
 0x104   :  { %1382 = vmatprep.subr.bf16.mxu0 %v1450_v3 }
 0x107   :  { %1384 = vmatpush3.bf16.msra.mxu0 %v1560_v11 }
 0x108   :  { %1385 = vmatprep.subr.bf16.mxu0 %v1450_v3 }
 0x10b   :  { %1388 = vmatpush3.bf16.msk.msra.mxu0 %vm1610_vm3, %v1596_v23 }
 0x10c   :  { %1405 = vmatprep.subr.bf16.mxu0 %v1450_v3 }
 0x10e   :  { %1270 = vmatmul.mubr.msk.f32.vlgmr.msra.gmra.mrb[4].mxu0 %vm106_vm4, %v448_v33  ;;  %v783_v33 = vmul.f32 %v1588_v17, %v782_v30 }
 0x10f   :  { %1306 = vmatprep.mubr.msk.f32.mxu0 %vm1451_vm0, %v1452_v6  ;;  %1407 = vmatpush3.bf16.msra.mxu0 %v1406_v5 }
 0x110   :  { %1304 = vmatprep.subr.mxu0 %v1452_v6  ;;  %v784_v12 = vadd.f32 %v783_v33, %v781_v32 }
 0x112   :  { %v787_v15 = vadd.f32 %v786_v34, %v784_v12 }
 0x113   :  { %1305 = vmatpush3.msk.msra.mxu0 %vm110_vm1, %v1115_v8 }
 0x114   :  { %1408 = vmatprep.subr.bf16.mxu0 %v1450_v3  ;;  %v788_v17 = vmax.f32 %v787_v15, 0.0 }
 0x1cf   :  { %v430_v38 = vpop.f32.mrb[2].mxu1 }
 0x1d0   :  { %v1252_v39 = vpop.f32.mrb[3].mxu1 }
 0x1d1   :  { %v354_v40 = vpop.f32.mrb[2].mxu0 }
 0x1d2   :  { %v431_v41 = vadd.f32 %v430_v38, %v354_v40  ;;  %v1243_v42 = vpop.f32.mrb[3].mxu0  ;;  %v952_v40 = vld [vmem:[%s1807_s5] sm:$0xff] }
 0x1e1   :  { %v518_v48 = vpop.f32.mrb[4].mxu0 }
 0x1e2   :  { %v519_v49 = vadd.f32 %v518_v48, %v1672_v62  ;;  %v1271_v50 = vpop.f32.mrb[5].mxu0 }
 0x1e4   :  { %v522_v54 = vmax.f32 %v519_v49, 0.0 }
 0x1e6   :  { %1279 = vmatmul.mubr.msk.f32.vlgmr.msra.gmra.mrb[4].mxu1 %vm281_vm5, %v522_v54  ;;  %v1128_v54 = vld [vmem:[%s1809_s7] ss:$0 sm:$0xff] }
 0x1e7   :  { %1394 = vmatpush3.bf16.msra.mxu1 %v1518_v4  ;;  %1297 = vmatprep.mubr.msk.f32.mxu1 %vm1451_vm0, %v1452_v6 }
 0x1e8   :  { %1395 = vmatprep.subr.bf16.mxu1 %v1450_v3 }
 0x1eb   :  { %1397 = vmatpush3.bf16.msra.mxu1 %v1531_v7 }
 0x1ec   :  { %1398 = vmatprep.subr.bf16.mxu1 %v1450_v3 }
 0x1ef   :  { %1400 = vmatpush3.bf16.msra.mxu1 %v1560_v11 }
 0x1f0   :  { %1401 = vmatprep.subr.bf16.mxu1 %v1450_v3 }
 0x1f3   :  { %1404 = vmatpush3.bf16.msk.msra.mxu1 %vm1610_vm3, %v1596_v23 }
 0x1f4   :  { %1421 = vmatprep.subr.bf16.mxu1 %v1450_v3 }
 0x1f6   :  { %1298 = vmatmul.mubr.msk.f32.vlgmr.msra.gmra.mrb[6].mxu1 %vm106_vm4, %v618_v0 }
 0x1f7   :  { %1334 = vmatprep.mubr.msk.f32.mxu1 %vm1451_vm0, %v1452_v6 }
 0x2b9   :  { %v599_v9 = vpop.f32.mrb[4].mxu1 }
 0x2ba   :  { %v603_v13 = vadd.f32 %v599_v9, %v431_v41  ;;  %v1280_v14 = vpop.f32.mrb[5].mxu1 }
 0x2c9   :  { %v688_v22 = vpop.f32.mrb[6].mxu1 }
 0x2ca   :  { %v689_v25 = vadd.f32 %v688_v22, %v1672_v62  ;;  %v1299_v26 = vpop.f32.mrb[7].mxu1 }
 0x2cc   :  { %v692_v31 = vmax.f32 %v689_v25, 0.0 }
 0x2ce   :  { %1307 = vmatmul.mubr.msk.f32.vlgmr.msra.gmra.mrb[6].mxu0 %vm281_vm5, %v692_v31 }
 0x2cf   :  { %1410 = vmatpush3.bf16.msra.mxu0 %v1518_v4  ;;  %1325 = vmatprep.mubr.msk.f32.mxu0 %vm1451_vm0, %v1452_v6  ;;  %v1120_v4 = vld [vmem:[%s1805_s3 + $0x60] sm:$0xff] }
 0x2d0   :  { %1411 = vmatprep.subr.bf16.mxu0 %v1450_v3 }
 0x2d3   :  { %1413 = vmatpush3.bf16.msra.mxu0 %v1531_v7  ;;  %v1121_v7 = vld [vmem:[%s1805_s3 + $0x68] sm:$0xff] }
 0x2d4   :  { %1414 = vmatprep.subr.bf16.mxu0 %v1450_v3  ;;  %v1422_v24 = vpack.c.bf16 %v1121_v7, %v1120_v4 }
 0x2d6   :  { %1423 = vmatpush3.bf16.msra.mxu1 %v1422_v24 }
 0x2d7   :  { %1416 = vmatpush3.bf16.msra.mxu0 %v1560_v11  ;;  %1332 = vmatprep.subr.mxu1 %v1452_v6  ;;  %v1122_v11 = vld [vmem:[%s1805_s3 + $0x70] sm:$0xf] }
 0x2d8   :  { %1417 = vmatprep.subr.bf16.mxu0 %v1450_v3 }
 0x2da   :  { %1333 = vmatpush3.msk.msra.mxu1 %vm110_vm1, %v1122_v11 }
 0x2db   :  { %1420 = vmatpush3.bf16.msk.msra.mxu0 %vm1610_vm3, %v1596_v23  ;;  %1424 = vmatprep.subr.bf16.mxu1 %v1450_v3  ;;  %v953_v3 = vld [vmem:[%s1807_s5 + $0x8] sm:$0x3] }
 0x2dc   :  { %v1425_v41 = vpack.c.bf16 %v953_v3, %v952_v40 }
 0x2de   :  { %1326 = vmatmul.mubr.msk.f32.vlgmr.msra.gmra.mrb[8].mxu0 %vm106_vm4, %v788_v17 }
 0x3a1   :  { %v769_v23 = vpop.f32.mrb[6].mxu0 }
 0x3a2   :  { %v773_v28 = vadd.f32 %v769_v23, %v603_v13  ;;  %v1308_v35 = vpop.f32.mrb[7].mxu0 }
 0x3b1   :  { %v858_v36 = vpop.f32.mrb[8].mxu0 }
 0x3b2   :  { %v859_v37 = vadd.f32 %v858_v36, %v1672_v62  ;;  %v1327_v38 = vpop.f32.mrb[9].mxu0  ;;  %v946_v62 = vsub.s32 1, %v1663_v59 }
 0x3b4   :  { %v862_v39 = vmax.f32 %v859_v37, 0.0  ;;  %v947_v42 = vrot.slane %v1669_v61, %v946_v62 }
 0x3b6   :  { %1335 = vmatmul.mubr.msk.f32.vlgmr.msra.gmra.mrb[8].mxu1 %vm281_vm5, %v862_v39 }
 0x3b7   :  { %1341 = vmatprep.mubr.msk.f32.mxu1 %vm1451_vm0, %v1452_v6  ;;  %1427 = vmatpush3.bf16.msk.msra.mxu1 %vm1426_vm7, %v1425_v41 }
 0x489   :  { %v939_v43 = vpop.f32.mrb[8].mxu1 }
 0x48a   :  { %v943_v44 = vadd.f32 %v939_v43, %v773_v28  ;;  %v1336_v6 = vpop.f32.mrb[9].mxu1 }
 0x48c   :  { %v948_v45 = vadd.f32 %v947_v42, %v943_v44 }
 0x48e   :  { %v949_v46 = vmax.f32 %v948_v45, 0.0 }
 0x490   :  { %951 = vst.msk [vmem:[%s1811_s9] sm:$0xff] %vm950_vm8, %v949_v46  ;;  %1342 = vmatmul.mubr.msk.f32.vlgmr.msra.gmra.mrb[10].mxu1 %vm950_vm8, %v949_v46  ;;  %v1031_v47 = vmul.f32 %v949_v46, %v949_v46 }
 0x492   :  { %v1032_v48 = vsel %vm950_vm8, %v1031_v47, 0.0 }
 0x493   :  { %1033 = vadd.xlane.f32.xlu0 %v1032_v48 }
 0x520   :  { %v1034_v49 = vpop.xlane.xlu0 %1033 }
 0x521   :  { %1433 = vrsqrt.f32 %v1034_v49  ;;  %vm1035_vm9 = vcmp.gt.f32.partialorder %v1034_v49, 0.0 }
 0x52b   :  { %v1434_v50 = vpop.eup %1433 }
 0x52c   :  { %v1037_v61 = vsel %vm1035_vm9, %v1434_v50, 0.0 }
 0x563   :  { %v1027_v59 = vpop.f32.mrb[10].mxu1 }
 0x564   :  { %v1038_v52 = vmul.f32 %v1037_v61, %v1027_v59  ;;  %v1343_v53 = vpop.f32.mrb[11].mxu1 }
 0x566   :  { %v1046_v55 = vmul.f32 %v1127_v51, %v1038_v52 }
 0x568   :  { %v1054_v56 = vadd.f32 %v1128_v54, %v1046_v55 }
 0x56a   :  { %1055 = vst [vmem:[%s1810_s8] sm:$0xff] %v1054_v56 }
 0x56b   :  { %1064 = vsyncpa [#allocation3], 1 }

// kernel: gnntest_forward.3
= control target key start
LH: loop header
LB: loop body
LE: loop exit
PB: predicated region body
PF: predicated region fallthrough
CT: control target
= control target key end

     0   :  { %v667_v0 = vmov 0   ;;  %v668_v1 = vmov 2   ;;  %v669_v3 = vmov 1   ;;  %v670_v4 = vmov 3   ;;  %s855_s0 = inlined_call_operand.vmem [shape: s32[8,5], index: 0, kind: input, shape index: {}]   ;;  %s856_s1 = inlined_call_operand.vmem [shape: f32[128,15], index: 1, kind: input, shape index: {}]   ;;  %s857_s3 = inlined_call_operand.vmem [shape: f32[10,15], index: 3, kind: input, shape index: {}]   ;;  %s858_s2 = inlined_call_operand.vmem [shape: f32[8,10], index: 2, kind: input, shape index: {}]   ;;  %s859_s4 = inlined_call_operand.vmem [shape: f32[15,10], index: 4, kind: input, shape index: {}]   ;;  %s860_s7 = inlined_call_operand.vmem [shape: f32[3,15], index: 7, kind: input, shape index: {}]   ;;  %s861_s5 = inlined_call_operand.vmem [shape: f32[15,10], index: 5, kind: input, shape index: {}]   ;;  %s862_s6 = inlined_call_operand.vmem [shape: f32[10,3], index: 6, kind: input, shape index: {}]   ;;  %s863_s8 = inlined_call_operand.vmem [shape: f32[8,3], index: 8, kind: output, shape index: {}]  }
   0x1   :  { %655 = vset.pattern.permute.xlu0 %v667_v0  ;;  %657 = vset.pattern.permute.xlu1 %v668_v1  ;;  %v30_v2 = vld [vmem:[%s855_s0] sm:$0xff]  ;;  %v671_v5 = vmov 4   ;;  %v672_v6 = vmov 0.0|0.0   ;;  %v70_v8 = vld [vmem:[%s856_s1 + $0x8] sm:$0xff]  ;;  %v71_v9 = vld [vmem:[%s856_s1 + $0x10] sm:$0xff]  ;;  %v31_v19 = vlaneseq  ;;  %v673_v25 = vmov 0.0  }
   0x2   :  { %34 = vperm.xlu0 %655, %v30_v2   ;;  %46 = vperm.xlu1 %657, %v30_v2   ;;  %v69_v7 = vld [vmem:[%s856_s1] sm:$0xff]  ;;  %v72_v11 = vld [vmem:[%s856_s1 + $0x18] sm:$0xff]  ;;  %v74_v14 = vld [vmem:[%s856_s1 + $0x28] sm:$0xff]  ;;  %vm674_vm5 = vmmov 0   ;;  %vm166_vm6 = vcmask 1041408   ;;  %vm675_vm7 = vmmov 1  }
   0x3   :  { %603 = vmatprep.subr.bf16.mxu0 %v672_v6  ;;  %627 = vmatprep.subr.bf16.mxu1 %v672_v6  ;;  %v604_v10 = vpack.c.bf16 %v70_v8, %v69_v7  ;;  %v607_v12 = vpack.c.bf16 %v72_v11, %v71_v9  ;;  %v73_v13 = vld [vmem:[%s856_s1 + $0x20] sm:$0xff]  ;;  %v75_v16 = vld [vmem:[%s856_s1 + $0x30] sm:$0xff]  ;;  %v76_v17 = vld [vmem:[%s856_s1 + $0x38] sm:$0xff]  ;;  %v32_v20 = vand.u32 127, %v31_v19  ;;  %vm251_vm9 = vcmask 1046528  }
   0x4   :  { %v610_v15 = vpack.c.bf16 %v74_v14, %v73_v13  ;;  %v613_v18 = vpack.c.bf16 %v76_v17, %v75_v16  ;;  %v77_v36 = vld [vmem:[%s856_s1 + $0x40] sm:$0xff]  ;;  %v78_v37 = vld [vmem:[%s856_s1 + $0x48] sm:$0xff]  ;;  %v79_v39 = vld [vmem:[%s856_s1 + $0x50] sm:$0xff]  ;;  %572 = vmatprep.mubr.msk.f32.mxu0 %vm674_vm5, %v673_v25  ;;  %579 = vmatprep.mubr.msk.f32.mxu1 %vm674_vm5, %v673_v25  ;;  %vm162_vm10 = vcmask 80896   ;;  %v159_v63 = vshrl.u32 %v31_v19, 7 }
   0x5   :  { %605 = vmatpush3.bf16.msra.mxu0 %v604_v10  ;;  %v616_v38 = vpack.c.bf16 %v78_v37, %v77_v36  ;;  %v80_v40 = vld [vmem:[%s856_s1 + $0x58] sm:$0xff]  ;;  %v81_v42 = vld [vmem:[%s856_s1 + $0x60] sm:$0xff]  ;;  %v82_v43 = vld [vmem:[%s856_s1 + $0x68] sm:$0xff]  ;;  %vm247_vm13 = vcmask 121856   ;;  %vm486_vm14 = vcmask 23552  }
   0x6   :  { %656 = vset.pattern.permute.xlu0 %v669_v3  ;;  %658 = vset.pattern.permute.xlu1 %v670_v4  ;;  %v619_v41 = vpack.c.bf16 %v80_v40, %v79_v39  ;;  %v622_v44 = vpack.c.bf16 %v82_v43, %v81_v42  ;;  %v83_v45 = vld [vmem:[%s856_s1 + $0x70] sm:$0xff]  ;;  %v84_v46 = vld [vmem:[%s856_s1 + $0x78] sm:$0xff]  ;;  %v156_v48 = vld [vmem:[%s857_s3] sm:$0xff]  ;;  %v160_v0 = vsub.s32 0, %v159_v63  ;;  %v245_v14 = vsub.s32 1, %v159_v63 }
   0x7   :  { %40 = vperm.xlu0 %656, %v30_v2   ;;  %52 = vperm.xlu1 %658, %v30_v2   ;;  %v625_v47 = vpack.c.bf16 %v84_v46, %v83_v45  ;;  %v157_v49 = vld [vmem:[%s857_s3 + $0x8] sm:$0x3]  ;;  %vm797_vm8 = vmpackc.low %vm166_vm6, %vm675_vm7  ;;  %v155_v52 = vld [vmem:[%s858_s2] sm:$0xff] }
   0x8   :  { %606 = vmatprep.subr.bf16.mxu0 %v672_v6  ;;  %v628_v50 = vpack.c.bf16 %v157_v49, %v156_v48  ;;  %v241_v53 = vld [vmem:[%s859_s4] sm:$0xff]  ;;  %vm810_vm11 = vmpackc.low %vm251_vm9, %vm675_vm7  ;;  %v242_v55 = vld [vmem:[%s859_s4 + $0x8] sm:$0x7f] }
   0x9   :  { %608 = vmatpush3.bf16.msra.mxu0 %v607_v12  ;;  %v632_v56 = vpack.c.bf16 %v242_v55, %v241_v53  ;;  %v29_v1 = vld [vmem:[%s860_s7] sm:$0x7]  ;;  %v326_v3 = vld [vmem:[%s861_s5 + $0x8] sm:$0x7f] }
   0xa   :  { %609 = vmatprep.subr.bf16.mxu0 %v672_v6  ;;  %630 = vmatpush3.bf16.msk.msra.mxu1 %vm797_vm8, %v628_v50  ;;  %v161_v4 = vrot.slane %v29_v1, %v160_v0  ;;  %v404_v10 = vld [vmem:[%s862_s6] sm:$0xff]  ;;  %v405_v11 = vld [vmem:[%s862_s6 + $0x8] sm:$0x3] }
   0xb   :  { %659 = vset.pattern.permute.xlu1 %v671_v5  ;;  %660 = vset.pattern.permute.xlu0 %v671_v5  ;;  %v640_v13 = vpack.c.bf16 %v405_v11, %v404_v10 }
   0xc   :  { %58 = vperm.xlu1 %659, %v30_v2   ;;  %631 = vmatprep.subr.bf16.mxu1 %v672_v6  ;;  %v325_v2 = vld [vmem:[%s861_s5] sm:$0xff] }
   0xd   :  { %611 = vmatpush3.bf16.msra.mxu0 %v610_v15  ;;  %580 = vmatmul.mubr.msk.f32.vlgmr.msra.gmra.mrb[0].mxu1 %vm162_vm10, %v155_v52  ;;  %v636_v5 = vpack.c.bf16 %v326_v3, %v325_v2  ;;  %v246_v15 = vrot.slane %v29_v1, %v245_v14 }
   0xe   :  { %612 = vmatprep.subr.bf16.mxu0 %v672_v6  ;;  %586 = vmatprep.mubr.msk.f32.mxu1 %vm674_vm5, %v673_v25 }
   0xf   :  { %634 = vmatpush3.bf16.msk.msra.mxu1 %vm810_vm11, %v632_v56 }
  0x10   :  { %635 = vmatprep.subr.bf16.mxu1 %v672_v6 }
  0x11   :  { %614 = vmatpush3.bf16.msra.mxu0 %v613_v18  ;;  %v408_v18 = vsub.s32 2, %v159_v63 }
  0x12   :  { %615 = vmatprep.subr.bf16.mxu0 %v672_v6 }
  0x13   :  { %v409_v19 = vrot.slane %v29_v1, %v408_v18 }
  0x15   :  { %617 = vmatpush3.bf16.msra.mxu0 %v616_v38 }
  0x16   :  { %618 = vmatprep.subr.bf16.mxu0 %v672_v6 }
  0x19   :  { %620 = vmatpush3.bf16.msra.mxu0 %v619_v41 }
  0x1a   :  { %621 = vmatprep.subr.bf16.mxu0 %v672_v6 }
  0x1d   :  { %623 = vmatpush3.bf16.msra.mxu0 %v622_v44 }
  0x1e   :  { %624 = vmatprep.subr.bf16.mxu0 %v672_v6 }
  0x21   :  { %626 = vmatpush3.bf16.msra.mxu0 %v625_v47 }
  0x81   :  { %v35_v21 = vpop.permute.xlu0 %34  ;;  %v47_v22 = vpop.permute.xlu1 %46 }
  0x82   :  { %vm36_vm0 = vcmp.eq.s32.totalorder %v32_v20, %v35_v21  ;;  %vm48_vm1 = vcmp.eq.s32.totalorder %v32_v20, %v47_v22 }
  0x83   :  { %v37_v26 = vsel %vm36_vm0, 1.0, %v673_v25  ;;  %v49_v29 = vsel %vm48_vm1, 1.0, %v673_v25 }
  0x86   :  { %v41_v23 = vpop.permute.xlu0 %40  ;;  %v53_v24 = vpop.permute.xlu1 %52 }
  0x87   :  { %vm42_vm2 = vcmp.eq.s32.totalorder %v32_v20, %v41_v23  ;;  %vm54_vm3 = vcmp.eq.s32.totalorder %v32_v20, %v53_v24 }
  0x88   :  { %v43_v27 = vsel %vm42_vm2, 1.0, %v673_v25  ;;  %v55_v32 = vsel %vm54_vm3, 1.0, %v673_v25 }
  0x89   :  { %v44_v28 = vadd.f32 %v43_v27, %v37_v26 }
  0x8b   :  { %v50_v30 = vadd.f32 %v49_v29, %v44_v28  ;;  %v59_v31 = vpop.permute.xlu1 %58 }
  0x8c   :  { %vm60_vm4 = vcmp.eq.s32.totalorder %v32_v20, %v59_v31 }
  0x8d   :  { %v56_v33 = vadd.f32 %v55_v32, %v50_v30  ;;  %v61_v34 = vsel %vm60_vm4, 1.0, %v673_v25 }
  0x8f   :  { %v62_v35 = vadd.f32 %v61_v34, %v56_v33 }
  0x91   :  { %63 = vadd.xlane.f32.xlu0 %v62_v35 }
  0xe0   :  { %v236_v61 = vpop.f32.mrb[0].mxu1 }
  0xe1   :  { %v581_v62 = vpop.f32.mrb[1].mxu1  ;;  %v237_v9 = vadd.f32 %v236_v61, %v161_v4 }
  0xe3   :  { %v240_v12 = vmax.f32 %v237_v9, 0.0 }
 0x11e   :  { %v64_v57 = vpop.xlane.xlu0 %63 }
 0x11f   :  { %vm65_vm12 = vcmp.gt.f32.partialorder %v64_v57, 0.0 }
 0x120   :  { %v66_v58 = vsel %vm65_vm12, %v64_v57, 1.0 }
 0x121   :  { %661 = vrcp.f32 %v66_v58 }
 0x12b   :  { %v662_v59 = vpop.eup %661 }
 0x12c   :  { %v68_v60 = vmul.f32 %v662_v59, %v62_v35 }
 0x12e   :  { %573 = vmatmul.mubr.f32.vlgmr.msra.gmra.mrb[0].mxu0 %v68_v60 }
 0x201   :  { %v151_v7 = vpop.f32.mrb[0].mxu0 }
 0x202   :  { %v574_v8 = vpop.f32.mrb[1].mxu0  ;;  %587 = vmatmul.mubr.msk.f32.vlgmr.msra.gmra.mrb[2].mxu1 %vm247_vm13, %v151_v7 }
 0x203   :  { %638 = vmatpush3.bf16.msk.msra.mxu1 %vm810_vm11, %v636_v5  ;;  %593 = vmatprep.mubr.msk.f32.mxu1 %vm674_vm5, %v673_v25 }
 0x204   :  { %639 = vmatprep.subr.bf16.mxu1 %v672_v6 }
 0x20a   :  { %594 = vmatmul.mubr.msk.f32.vlgmr.msra.gmra.mrb[2].mxu1 %vm247_vm13, %v240_v12 }
 0x20b   :  { %642 = vmatpush3.bf16.msk.msra.mxu1 %vm797_vm8, %v640_v13  ;;  %600 = vmatprep.mubr.msk.f32.mxu1 %vm674_vm5, %v673_v25 }
 0x2dd   :  { %v399_v6 = vpop.f32.mrb[2].mxu1 }
 0x2de   :  { %v643_v16 = vadd.f32 %v399_v6, %v246_v15  ;;  %v595_v17 = vpop.f32.mrb[3].mxu1 }
 0x2e0   :  { %601 = vmatmul.mubr.msk.f32.vlgmr.msra.gmra.mrb[4].mxu1 %vm162_vm10, %v643_v16 }
 0x3b3   :  { %v482_v20 = vpop.f32.mrb[4].mxu1 }
 0x3b4   :  { %v483_v21 = vadd.f32 %v482_v20, %v409_v19  ;;  %v602_v22 = vpop.f32.mrb[5].mxu1 }
 0x3b6   :  { %v487_v23 = vsel %vm486_vm14, %v483_v21, -inf }
 0x3b7   :  { %488 = vmax.xlane.f32.xlu1 %v487_v23 }
 0x444   :  { %v489_v24 = vpop.xlane.xlu1 %488 }
 0x445   :  { %v490_v26 = vsub.f32 %v483_v21, %v489_v24 }
 0x447   :  { %v491_v27 = vmul.f32 1.442695, %v490_v26 }
 0x449   :  { %663 = vpow2.f32 %v491_v27 }
 0x453   :  { %v664_v25 = vpop.eup %663 }
 0x454   :  { %v493_v28 = vsel %vm486_vm14, %v664_v25, 0.0 }
 0x455   :  { %494 = vadd.xlane.f32.xlu0 %v493_v28 }
 0x4e2   :  { %v495_v29 = vpop.xlane.xlu0 %494 }
 0x4e3   :  { %665 = vrcp.f32 %v495_v29 }
 0x4ed   :  { %v666_v30 = vpop.eup %665 }
 0x4ee   :  { %v497_v31 = vmul.f32 %v666_v30, %v664_v25 }
 0x4f0   :  { %498 = vst.msk [vmem:[%s863_s8] sm:$0xff] %vm486_vm14, %v497_v31 }

</bundles_post_ra>
